<compile_context>
chip_gen: v7x
topology: tpu7x:2x2x1
jax: 0.10.0
libtpu: 0.0.40
codegen_flags: <defaults>
</compile_context>

<pallas_src>
import jax
import jax.numpy as jnp
from jax import lax
from jax.experimental import pallas as pl
from jax.experimental.pallas import tpu as pltpu


# ----------------------------- Pallas kernel --------------------------------


def _stego_loss_kernel(f1_ref, f2_ref, c1_ref, c2_ref, out_ref):
    """One (pair, batch) element.

    f1_ref : (1, P, Cf)     sampled feats, channel-last  (MXU LHS, no transpose)
    f2_ref : (1, 1, Cf, P)  pos/neg feats, channel-first (MXU RHS)
    c1_ref : (1, P, Cc)     sampled code,  channel-last
    c2_ref : (1, 1, Cc, P)  pos/neg code,  channel-first
    out_ref: (1, 1, 1, P)   lane-dense partial sums  sum_p loss[p, q]
    """
    f1 = f1_ref[0]        # (P, Cf)
    f2 = f2_ref[0, 0]     # (Cf, P)
    c1 = c1_ref[0]        # (P, Cc)
    c2 = c2_ref[0, 0]     # (Cc, P)

    inv_eps = jnp.float32(1e10)  # 1 / eps,  eps = 1e-10 as in F.normalize

    # F.normalize(t, dim=1, eps) == t / max(||t||, eps) == t * min(rsqrt(ss), 1/eps)
    inv1 = jnp.minimum(lax.rsqrt(jnp.sum(f1 * f1, axis=1, keepdims=True)), inv_eps)
    inv2 = jnp.minimum(lax.rsqrt(jnp.sum(f2 * f2, axis=0, keepdims=True)), inv_eps)
    f1h = f1 * inv1
    f2h = f2 * inv2

    # tensor_correlation: fd[p, q] = sum_c f1h[p, c] * f2h[c, q]   (MXU)
    # (kept in f32; bf16-casting the operands is a possible v6e/v7x tweak)
    fd = jnp.dot(f1h, f2h, preferred_element_type=jnp.float32)

    # log_softmax over the channel axis.
    lp1 = c1 - jnp.max(c1, axis=1, keepdims=True)
    lp1 = lp1 - jnp.log(jnp.sum(jnp.exp(lp1), axis=1, keepdims=True))
    lp2 = c2 - jnp.max(c2, axis=0, keepdims=True)
    lp2 = lp2 - jnp.log(jnp.sum(jnp.exp(lp2), axis=0, keepdims=True))

    q2 = jnp.exp(lp2)                                   # (Cc, P)
    h2 = jnp.sum(q2 * lp2, axis=0, keepdims=True)       # (1, P)  = sum_c q2*lp2
    m = jnp.dot(lp1, q2, preferred_element_type=jnp.float32)  # (P, P)  (MXU)

    # kl_div(log_target=True).sum(channel): cd[p, q] = h2[q] - m[p, q]
    cd = (h2 - m) - jnp.float32(1.1)   # NOTE: the reference helper hardcodes 1.1
    # 1 - 2*sigmoid(cd) == -tanh(cd/2): one EUP op instead of exp + divide.
    cd = -jnp.tanh(jnp.float32(0.5) * cd)

    diff = fd - cd
    sq = diff * diff

    # Reduce the p (sublane) axis in-kernel; the remaining tiny (pairs, B, P)
    # reduction is finished in the wrapper.  Output stays lane-dense (width P).
    out_ref[0, 0] = jnp.sum(sq, axis=0, keepdims=True)


def stego_loss_partial_sums(f1t, f2s, c1t, c2s):
    """f1t: (B, P, Cf); f2s: (NP, B, Cf, P); c1t: (B, P, Cc); c2s: (NP, B, Cc, P)
    -> (NP, B, 1, P) partial row-sums of the per-pair (P, P) loss."""
    B, P, Cf = f1t.shape
    NP = f2s.shape[0]
    Cc = c1t.shape[2]
    # Perf note: keep P a multiple of 128 (lane-dense stores / (8,128) tiling);
    # the demo uses S=16 -> P=256.  Smaller / odd P is still correct, just slower.
    # For much larger P (>~512), add a q-tile grid axis and set vmem_limit_bytes
    # (the in-kernel (P,P) temporaries are the only VMEM consumers now).
    return pl.pallas_call(
        _stego_loss_kernel,
        out_shape=jax.ShapeDtypeStruct((NP, B, 1, P), jnp.float32),
        grid=(B, NP),  # pair axis innermost -> f1/c1 blocks reused across pairs
        in_specs=[
            pl.BlockSpec((1, P, Cf), lambda b, p: (b, 0, 0)),
            pl.BlockSpec((1, 1, Cf, P), lambda b, p: (p, b, 0, 0)),
            pl.BlockSpec((1, P, Cc), lambda b, p: (b, 0, 0)),
            pl.BlockSpec((1, 1, Cc, P), lambda b, p: (p, b, 0, 0)),
        ],
        out_specs=pl.BlockSpec((1, 1, 1, P), lambda b, p: (p, b, 0, 0)),
        compiler_params=pltpu.CompilerParams(
            dimension_semantics=("parallel", "parallel")),
    )(f1t, f2s, c1t, c2s)


# ------------------------------ JAX glue -------------------------------------
# TODO(synk): bilinear grid_sample (data-dependent gather), random coordinate
# generation and the batch permutation stay in plain JAX — no clean BlockSpec
# expression, and at these sizes a Pallas DMA-gather kernel would not pay off.


def grid_sample_bilinear_border(img, grid):
    """torch.nn.functional.grid_sample(img, grid, mode='bilinear',
    padding_mode='border', align_corners=True).
    img: (N, C, H, W), grid: (N, Ho, Wo, 2) with (x, y) in [-1, 1]."""
    N, C, H, W = img.shape
    x = grid[..., 0]
    y = grid[..., 1]
    ix = (x + 1.0) * 0.5 * (W - 1)
    iy = (y + 1.0) * 0.5 * (H - 1)
    ix = jnp.clip(ix, 0.0, W - 1)
    iy = jnp.clip(iy, 0.0, H - 1)
    x0 = jnp.floor(ix)
    y0 = jnp.floor(iy)
    wx = ix - x0
    wy = iy - y0
    x0i = jnp.clip(x0, 0, W - 1).astype(jnp.int32)
    x1i = jnp.clip(x0 + 1.0, 0, W - 1).astype(jnp.int32)
    y0i = jnp.clip(y0, 0, H - 1).astype(jnp.int32)
    y1i = jnp.clip(y0 + 1.0, 0, H - 1).astype(jnp.int32)

    flat = img.reshape(N, C, H * W)
    Ho, Wo = x.shape[1], x.shape[2]

    def gather(yi, xi):
        idx = (yi * W + xi).reshape(N, 1, Ho * Wo)
        g = jnp.take_along_axis(flat, jnp.broadcast_to(idx, (N, C, Ho * Wo)), axis=2)
        return g.reshape(N, C, Ho, Wo)

    v00 = gather(y0i, x0i)
    v01 = gather(y0i, x1i)
    v10 = gather(y1i, x0i)
    v11 = gather(y1i, x1i)
    wx = wx[:, None]
    wy = wy[:, None]
    return (
        v00 * (1.0 - wx) * (1.0 - wy)
        + v01 * wx * (1.0 - wy)
        + v10 * (1.0 - wx) * wy
        + v11 * wx * wy
    )


def super_perm_jax(key, size):
    perm = jax.random.permutation(key, size)
    perm = jnp.where(perm == jnp.arange(size), perm + 1, perm)
    return perm % size


def stego_loss_v2_forward(key, orig_feats, orig_code, cfg):
    """Mirrors STEGOLOSSv2.forward; returns (pos_intra_loss, neg_inter_loss, aux)."""
    B, Cf = orig_feats.shape[:2]
    Cc = orig_code.shape[1]
    S = cfg["feature_samples"]
    neg = cfg["neg_samples"]
    P = S * S
    keys = jax.random.split(key, 2 + neg)

    coords1 = jax.random.uniform(keys[0], (B, S, S, 2), jnp.float32) * 2.0 - 1.0
    coords2 = jax.random.uniform(keys[1], (B, S, S, 2), jnp.float32) * 2.0 - 1.0
    grid1 = jnp.transpose(coords1, (0, 2, 1, 3))  # coords.permute(0, 2, 1, 3)
    grid2 = jnp.transpose(coords2, (0, 2, 1, 3))

    feats = grid_sample_bilinear_border(orig_feats, grid1)  # (B, Cf, S, S)
    code = grid_sample_bilinear_border(orig_code, grid1)    # (B, Cc, S, S)

    f2_list = [feats]
    c2_list = [code]
    for i in range(neg):
        perm = super_perm_jax(keys[2 + i], B)
        f2_list.append(grid_sample_bilinear_border(orig_feats[perm], grid2))
        c2_list.append(grid_sample_bilinear_border(orig_code[perm], grid2))

    # Layout plumbing (cheap, wrapper-side): left operands channel-last,
    # right operands stacked along a new leading pair axis, channel-first.
    f1_flat = feats.reshape(B, Cf, P)
    c1_flat = code.reshape(B, Cc, P)
    f1t = jnp.transpose(f1_flat, (0, 2, 1))                              # (B, P, Cf)
    c1t = jnp.transpose(c1_flat, (0, 2, 1))                              # (B, P, Cc)
    f2s = jnp.stack([t.reshape(B, Cf, P) for t in f2_list], axis=0)      # (NP, B, Cf, P)
    c2s = jnp.stack([t.reshape(B, Cc, P) for t in c2_list], axis=0)      # (NP, B, Cc, P)

    partial = stego_loss_partial_sums(f1t, f2s, c1t, c2s)  # (NP, B, 1, P)
    per_pair_b = jnp.sum(partial, axis=(2, 3))             # (NP, B) loss sums

    denom = jnp.float32(P) * jnp.float32(P)
    pos_intra_loss = jnp.sum(per_pair_b[0]) / (B * denom)
    neg_inter_loss = jnp.sum(per_pair_b[1:]) / (neg * B * denom)
    return pos_intra_loss, neg_inter_loss, (f1_flat, c1_flat, f2s, c2s, per_pair_b)


def _reference_loss(f1, f2, c1, c2):
    """Pure-JAX reference of STEGOLOSSv2.helper on (B, C, P) tensors."""
    eps = 1e-10
    f1h = f1 / jnp.maximum(jnp.linalg.norm(f1, axis=1, keepdims=True), eps)
    f2h = f2 / jnp.maximum(jnp.linalg.norm(f2, axis=1, keepdims=True), eps)
    fd = jnp.einsum("bcp,bcq->bpq", f1h, f2h)
    lp1 = jax.nn.log_softmax(c1, axis=1)
    lp2 = jax.nn.log_softmax(c2, axis=1)
    q2 = jnp.exp(lp2)
    kl = jnp.einsum("bcq,bcq->bq", q2, lp2)[:, None, :] - jnp.einsum(
        "bcp,bcq->bpq", lp1, q2
    )
    cd = kl - 1.1
    cd = 1.0 - 2.0 / (1.0 + jnp.exp(-cd))
    return (fd - cd) ** 2


if __name__ == "__main__":
    cfg = {
        "feature_samples": 16,  # S -> P = 256 sample points (multiple of 128)
        "neg_samples": 2,
        "corr_loss": {"pos_intra_shift": 0.18, "neg_inter_shift": 0.46},  # unused by helper
    }

    key = jax.random.PRNGKey(0)
    k_feats, k_code, k_fwd = jax.random.split(key, 3)

    B, Cf, Cc, H, W = 2, 32, 16, 16, 16
    orig_feats = jax.random.normal(k_feats, (B, Cf, H, W), jnp.float32)
    orig_code = jax.random.normal(k_code, (B, Cc, H, W), jnp.float32)

    pos_loss, neg_loss, (f1_flat, c1_flat, f2s, c2s, per_pair_b) = stego_loss_v2_forward(
        k_fwd, orig_feats, orig_code, cfg
    )
    pos_loss = jax.block_until_ready(pos_loss)
    neg_loss = jax.block_until_ready(neg_loss)

    # Sanity-check the fused kernel against a plain-JAX reference of the
    # un-fused (B, P, P) loss (only the reference materializes it).
    P = cfg["feature_samples"] ** 2
    NP = 1 + cfg["neg_samples"]
    ref_sums = []
    for p in range(NP):
        ref_loss = _reference_loss(f1_flat, f2s[p], c1_flat, c2s[p])  # (B, P, P)
        ref_sums.append(jnp.sum(ref_loss, axis=(1, 2)))
    ref_sums = jnp.stack(ref_sums, axis=0)  # (NP, B)
    ref_pos = jnp.sum(ref_sums[0]) / (B * P * P)
    ref_neg = jnp.sum(ref_sums[1:]) / (cfg["neg_samples"] * B * P * P)

    assert jnp.allclose(per_pair_b, ref_sums, rtol=2e-3, atol=1e-2), "kernel sum mismatch"
    assert jnp.allclose(pos_loss, ref_pos, rtol=2e-3, atol=1e-4), "pos loss mismatch"
    assert jnp.allclose(neg_loss, ref_neg, rtol=2e-3, atol=1e-4), "neg loss mismatch"
    assert jnp.isfinite(pos_loss) and jnp.isfinite(neg_loss)

    print("KERNEL_OK")
</pallas_src>

<mosaic_0001>
module attributes {stable_mosaic.version = 11 : i64} {
  func.func @_stego_loss_kernel(%arg0: i32, %arg1: i32, %arg2: memref<1x256x32xf32, #tpu.memory_space<vmem>>, %arg3: memref<1x1x32x256xf32, #tpu.memory_space<vmem>>, %arg4: memref<1x256x16xf32, #tpu.memory_space<vmem>>, %arg5: memref<1x1x16x256xf32, #tpu.memory_space<vmem>>, %arg6: memref<1x1x1x256xf32, #tpu.memory_space<vmem>>) attributes {dimension_semantics = [#tpu.dimension_semantics<parallel>, #tpu.dimension_semantics<parallel>], iteration_bounds = array<i64: 2, 3>, scalar_prefetch = 0 : i64, scratch_operands = 0 : i64, tpu.core_type = #tpu.core_type<tc>, window_params = [{transform_indices = @transform_0, window_bounds = array<i64: 1, 256, 32>}, {transform_indices = @transform_1, window_bounds = array<i64: 1, 1, 32, 256>}, {transform_indices = @transform_2, window_bounds = array<i64: 1, 256, 16>}, {transform_indices = @transform_3, window_bounds = array<i64: 1, 1, 16, 256>}, {transform_indices = @transform_4, window_bounds = array<i64: 1, 1, 1, 256>}]} {
    %c0 = arith.constant 0 : index
    %c0_0 = arith.constant 0 : index
    %c0_1 = arith.constant 0 : index
    %0 = vector.load %arg2[%c0, %c0_0, %c0_1] : memref<1x256x32xf32, #tpu.memory_space<vmem>>, vector<1x256x32xf32>
    %1 = vector.shape_cast %0 : vector<1x256x32xf32> to vector<256x32xf32>
    %c0_2 = arith.constant 0 : index
    %c0_3 = arith.constant 0 : index
    %c0_4 = arith.constant 0 : index
    %c0_5 = arith.constant 0 : index
    %2 = vector.load %arg3[%c0_2, %c0_3, %c0_4, %c0_5] : memref<1x1x32x256xf32, #tpu.memory_space<vmem>>, vector<1x1x32x256xf32>
    %3 = vector.shape_cast %2 : vector<1x1x32x256xf32> to vector<32x256xf32>
    %c0_6 = arith.constant 0 : index
    %c0_7 = arith.constant 0 : index
    %c0_8 = arith.constant 0 : index
    %4 = vector.load %arg4[%c0_6, %c0_7, %c0_8] : memref<1x256x16xf32, #tpu.memory_space<vmem>>, vector<1x256x16xf32>
    %5 = vector.shape_cast %4 : vector<1x256x16xf32> to vector<256x16xf32>
    %c0_9 = arith.constant 0 : index
    %c0_10 = arith.constant 0 : index
    %c0_11 = arith.constant 0 : index
    %c0_12 = arith.constant 0 : index
    %6 = vector.load %arg5[%c0_9, %c0_10, %c0_11, %c0_12] : memref<1x1x16x256xf32, #tpu.memory_space<vmem>>, vector<1x1x16x256xf32>
    %7 = vector.shape_cast %6 : vector<1x1x16x256xf32> to vector<16x256xf32>
    %8 = arith.mulf %1, %1 : vector<256x32xf32>
    %cst = arith.constant dense<0.000000e+00> : vector<256xf32>
    %9 = vector.multi_reduction <add>, %8, %cst [1] : vector<256x32xf32> to vector<256xf32>
    %10 = vector.shape_cast %9 : vector<256xf32> to vector<256x1xf32>
    %11 = math.rsqrt %10 : vector<256x1xf32>
    %cst_13 = arith.constant 1.000000e+10 : f32
    %12 = vector.broadcast %cst_13 : f32 to vector<256x1xf32>
    %13 = arith.minimumf %11, %12 : vector<256x1xf32>
    %14 = arith.mulf %3, %3 : vector<32x256xf32>
    %cst_14 = arith.constant dense<0.000000e+00> : vector<256xf32>
    %15 = vector.multi_reduction <add>, %14, %cst_14 [0] : vector<32x256xf32> to vector<256xf32>
    %16 = vector.shape_cast %15 : vector<256xf32> to vector<1x256xf32>
    %17 = math.rsqrt %16 : vector<1x256xf32>
    %cst_15 = arith.constant 1.000000e+10 : f32
    %18 = vector.broadcast %cst_15 : f32 to vector<1x256xf32>
    %19 = arith.minimumf %17, %18 : vector<1x256xf32>
    %20 = vector.broadcast %13 : vector<256x1xf32> to vector<256x32xf32>
    %21 = arith.mulf %1, %20 : vector<256x32xf32>
    %22 = vector.broadcast %19 : vector<1x256xf32> to vector<32x256xf32>
    %23 = arith.mulf %3, %22 : vector<32x256xf32>
    %cst_16 = arith.constant dense<0.000000e+00> : vector<256x256xf32>
    %24 = tpu.matmul %21, %23, %cst_16 {dimension_numbers = #tpu.dot_dimension_numbers<[1], [0], [0], [1], [0, 0, 1, 1], [], []>} : vector<256x32xf32>, vector<32x256xf32>, vector<256x256xf32> -> vector<256x256xf32>
    %cst_17 = arith.constant dense<0xFF800000> : vector<256xf32>
    %25 = vector.multi_reduction <maximumf>, %5, %cst_17 [1] : vector<256x16xf32> to vector<256xf32>
    %26 = vector.shape_cast %25 : vector<256xf32> to vector<256x1xf32>
    %27 = vector.broadcast %26 : vector<256x1xf32> to vector<256x16xf32>
    %28 = arith.subf %5, %27 : vector<256x16xf32>
    %29 = math.exp %28 : vector<256x16xf32>
    %cst_18 = arith.constant dense<0.000000e+00> : vector<256xf32>
    %30 = vector.multi_reduction <add>, %29, %cst_18 [1] : vector<256x16xf32> to vector<256xf32>
    %31 = vector.shape_cast %30 : vector<256xf32> to vector<256x1xf32>
    %32 = math.log %31 : vector<256x1xf32>
    %33 = vector.broadcast %32 : vector<256x1xf32> to vector<256x16xf32>
    %34 = arith.subf %28, %33 : vector<256x16xf32>
    %cst_19 = arith.constant dense<0xFF800000> : vector<256xf32>
    %35 = vector.multi_reduction <maximumf>, %7, %cst_19 [0] : vector<16x256xf32> to vector<256xf32>
    %36 = vector.shape_cast %35 : vector<256xf32> to vector<1x256xf32>
    %37 = vector.broadcast %36 : vector<1x256xf32> to vector<16x256xf32>
    %38 = arith.subf %7, %37 : vector<16x256xf32>
    %39 = math.exp %38 : vector<16x256xf32>
    %cst_20 = arith.constant dense<0.000000e+00> : vector<256xf32>
    %40 = vector.multi_reduction <add>, %39, %cst_20 [0] : vector<16x256xf32> to vector<256xf32>
    %41 = vector.shape_cast %40 : vector<256xf32> to vector<1x256xf32>
    %42 = math.log %41 : vector<1x256xf32>
    %43 = vector.broadcast %42 : vector<1x256xf32> to vector<16x256xf32>
    %44 = arith.subf %38, %43 : vector<16x256xf32>
    %45 = math.exp %44 : vector<16x256xf32>
    %46 = arith.mulf %45, %44 : vector<16x256xf32>
    %cst_21 = arith.constant dense<0.000000e+00> : vector<256xf32>
    %47 = vector.multi_reduction <add>, %46, %cst_21 [0] : vector<16x256xf32> to vector<256xf32>
    %48 = vector.shape_cast %47 : vector<256xf32> to vector<1x256xf32>
    %cst_22 = arith.constant dense<0.000000e+00> : vector<256x256xf32>
    %49 = tpu.matmul %34, %45, %cst_22 {dimension_numbers = #tpu.dot_dimension_numbers<[1], [0], [0], [1], [0, 0, 1, 1], [], []>} : vector<256x16xf32>, vector<16x256xf32>, vector<256x256xf32> -> vector<256x256xf32>
    %50 = vector.broadcast %48 : vector<1x256xf32> to vector<256x256xf32>
    %51 = arith.subf %50, %49 : vector<256x256xf32>
    %cst_23 = arith.constant 1.100000e+00 : f32
    %52 = vector.broadcast %cst_23 : f32 to vector<256x256xf32>
    %53 = arith.subf %51, %52 : vector<256x256xf32>
    %cst_24 = arith.constant 5.000000e-01 : f32
    %54 = vector.broadcast %cst_24 : f32 to vector<256x256xf32>
    %55 = arith.mulf %54, %53 : vector<256x256xf32>
    %56 = math.tanh %55 : vector<256x256xf32>
    %cst_25 = arith.constant 0.000000e+00 : f32
    %57 = vector.broadcast %cst_25 : f32 to vector<256x256xf32>
    %58 = arith.subf %57, %56 : vector<256x256xf32>
    %59 = arith.subf %24, %58 : vector<256x256xf32>
    %60 = arith.mulf %59, %59 : vector<256x256xf32>
    %cst_26 = arith.constant dense<0.000000e+00> : vector<256xf32>
    %61 = vector.multi_reduction <add>, %60, %cst_26 [0] : vector<256x256xf32> to vector<256xf32>
    %62 = vector.shape_cast %61 : vector<256xf32> to vector<1x256xf32>
    %c0_27 = arith.constant 0 : index
    %c0_28 = arith.constant 0 : index
    %c0_29 = arith.constant 0 : index
    %c0_30 = arith.constant 0 : index
    %63 = vector.load %arg6[%c0_27, %c0_28, %c0_29, %c0_30] : memref<1x1x1x256xf32, #tpu.memory_space<vmem>>, vector<1x1x1x256xf32>
    %64 = vector.shape_cast %63 : vector<1x1x1x256xf32> to vector<1x256xf32>
    %65 = vector.shape_cast %62 : vector<1x256xf32> to vector<1x1x1x256xf32>
    tpu.vector_store %arg6[%c0_27, %c0_28, %c0_29, %c0_30], %65 {strides = array<i32>} : memref<1x1x1x256xf32, #tpu.memory_space<vmem>>, vector<1x1x1x256xf32>,
    return
  }
  func.func @transform_0(%arg0: i32, %arg1: i32) -> (i32, i32, i32) {
    %c0_i32 = arith.constant 0 : i32
    %c0_i32_0 = arith.constant 0 : i32
    %c0_i32_1 = arith.constant 0 : i32
    return %arg0, %c0_i32, %c0_i32_0 : i32, i32, i32
  }
  func.func @transform_1(%arg0: i32, %arg1: i32) -> (i32, i32, i32, i32) {
    %c0_i32 = arith.constant 0 : i32
    %c0_i32_0 = arith.constant 0 : i32
    %c0_i32_1 = arith.constant 0 : i32
    return %arg1, %arg0, %c0_i32, %c0_i32_0 : i32, i32, i32, i32
  }
  func.func @transform_2(%arg0: i32, %arg1: i32) -> (i32, i32, i32) {
    %c0_i32 = arith.constant 0 : i32
    %c0_i32_0 = arith.constant 0 : i32
    %c0_i32_1 = arith.constant 0 : i32
    return %arg0, %c0_i32, %c0_i32_0 : i32, i32, i32
  }
  func.func @transform_3(%arg0: i32, %arg1: i32) -> (i32, i32, i32, i32) {
    %c0_i32 = arith.constant 0 : i32
    %c0_i32_0 = arith.constant 0 : i32
    %c0_i32_1 = arith.constant 0 : i32
    return %arg1, %arg0, %c0_i32, %c0_i32_0 : i32, i32, i32, i32
  }
  func.func @transform_4(%arg0: i32, %arg1: i32) -> (i32, i32, i32, i32) {
    %c0_i32 = arith.constant 0 : i32
    %c0_i32_0 = arith.constant 0 : i32
    %c0_i32_1 = arith.constant 0 : i32
    return %arg1, %arg0, %c0_i32, %c0_i32_0 : i32, i32, i32, i32
  }
}

</mosaic_0001>

<bundles_post_ra>
// kernel: tpu_custom_call.1
= control target key start
LH: loop header
LB: loop body
LE: loop exit
PB: predicated region body
PF: predicated region fallthrough
CT: control target
= control target key end

     0   :  { %9 = vsyncpa [#allocation3], 0  ;;  %s4259_s0 = inlined_call_operand.vmem [shape: f32[2,256,32], index: 0, kind: input, shape index: {}]   ;;  %s4260_s1 = inlined_call_operand.vmem [shape: f32[3,2,32,256], index: 1, kind: input, shape index: {}]   ;;  %s4261_s2 = inlined_call_operand.vmem [shape: f32[2,256,16], index: 2, kind: input, shape index: {}]   ;;  %s4262_s3 = inlined_call_operand.vmem [shape: f32[3,2,16,256], index: 3, kind: input, shape index: {}]   ;;  %s4263_s4 = inlined_call_operand.hbm [shape: f32[3,2,1,256], index: 4, kind: output, shape index: {}]  }
   0x1   :  { %11 = vsyncpa [#allocation3 + $0x1], 0  ;;  %s3196_s15 = smov 0   ;;  %s3198_s16 = smov 0  }
   0x2   :  { %s3200_s17 = smov 0   ;;  %s3202_s18 = smov 0  }
   0x3   :  { %s3204_s19 = smov 0   ;;  %s3206_s20 = smov 0  }
   0x4   :  { %s3208_s21 = smov 0   ;;  %s3210_s22 = smov 0  }
   0x5 LB: > { %s2491_s23 = sadd.s32 4294967295, %s3166_s22   ;;  %s2492_s24 = sadd.s32 4294967294, %s3166_s22   ;;  %s3166_s22 = sphi %s3210_s22, %s17_s22   ;;  %s3162_s21 = sphi %s3208_s21, %s4317_s21   ;;  %s3158_s20 = sphi %s3206_s20, %s4316_s20   ;;  %s3154_s19 = sphi %s3204_s19, %s4315_s19   ;;  %s3150_s18 = sphi %s3202_s18, %s4314_s18   ;;  %s3146_s17 = sphi %s3200_s17, %s4313_s17   ;;  %s3142_s16 = sphi %s3198_s16, %s4312_s16   ;;  %s3138_s15 = sphi %s3196_s15, %s4311_s15  }
   0x6   : > { %s26_s25 = sadd.s32 1, %s3158_s20  ;;  %s29_s26 = sadd.s32 1, %s3162_s21 }
   0x7   : > { %p27_p0 = scmp.ge.s32.totalorder %s26_s25, 3  ;;  %p156_p1 = scmp.ne.s32.totalorder %s3146_s17, %s3142_s16 }
   0x8   : > { %p157_p2 = scmp.eq.s32.totalorder %s2491_s23, 5  ;;  %p162_p5 = scmp.ne.s32.totalorder %s3142_s16, %s3138_s15 }
   0x9   : > { %s4319_s25 = smov (%p27_p0, %s26_s25), 0  ;;  %s4321_s26 = smov (!%p27_p0, %s29_s26), %s3162_s21 }
   0xa   : > { %s141_s27 = ssub.s32 %s3158_s20, %s4319_s25  ;;  %p3247_p3 = por %p157_p2, %p156_p1 }
   0xb   : > { %p31_p4 = scmp.ge.s32.totalorder %s4321_s26, 2  ;;  %p163_p6 = scmp.eq.s32.totalorder %s2492_s24, 5 }
   0xc   : > { %p2495_p7 = scmp.ge.s32.totalorder %s3166_s22, 1  ;;  %p221_p9 = scmp.lt.s32.totalorder %s3166_s22, 7 }
   0xd   : > { %s4323_s26 = smov (%p31_p4, %s4321_s26), 0  ;;  %p3256_p8 = por %p163_p6, %p162_p5 }
   0xe   : > { %s142_s30 = ssub.s32 %s3162_s21, %s4323_s26  ;;  %s146_s5 = sadd.s32 1, %s3146_s17 }
   0xf   : > { %s143_s6 = sor.u32 %s142_s30, %s141_s27  ;;  %p222_p10 = pnand %p2495_p7, %p221_p9 }
  0x10   : > { %p144_p11 = scmp.eq.s32.totalorder %s143_s6, 0 }
  0x11   : > { %225 = sbr.rel (%p222_p10) target bundleno = 812 (0x32c), region = 36 }
  0x12   : > { %s3265_s7 = scalar_select %p144_p11, %s3146_s17, %s146_s5  }
  0x18   : > { %p270_p12 = scmp.lt.s32.totalorder %s3154_s19, 1  ;;  %vm990_vm0 = vcmask 130048   ;;  %vm406_vm1 = vcmask 261120   ;;  %p275_p13 = scmp.lt.s32.totalorder %s3150_s18, 2 }
  0x1a   : > { %s3269_s8 = scalar_select %p270_p12, %s3154_s19, 1 }
  0x1b   : > { %s3451_s24 = scalar_select %p275_p13, %s3150_s18, 2 }
  0x1c   : > { %s2641_s9 = sshll.u32 %s3269_s8, 8  ;;  %s2504_s27 = sshll.u32 %s3269_s8, 2 }
  0x1d   : > { %s3277_s12 = scalar_lea.vmem %s4261_s2, %s2641_s9  ;;  %s3390_s23 = scalar_lea.vmem %s4259_s0, %s2641_s9 }
  0x1e   : > { %v3280_v0 = vld [vmem:[%s3277_s12 + $0x10] sm:$0xff]  ;;  %v3283_v1 = vld [vmem:[%s3277_s12] sm:$0xff]  ;;  %v3286_v2 = vld [vmem:[%s3277_s12 + $0x18] sm:$0xff]  ;;  %s2505_s30 = sshll.u32 %s3451_s24, 3  ;;  %s2499_s13 = sshll.u32 %s3269_s8, 3 }
  0x1f   : > { %v997_v3 = vsel %vm990_vm0, %v3280_v0, -inf  ;;  %v991_v4 = vsel %vm990_vm0, %v3283_v1, -inf  ;;  %v3293_v5 = vld [vmem:[%s3277_s12 + $0x8] sm:$0xff]  ;;  %v1000_v6 = vsel %vm990_vm0, %v3286_v2, -inf  ;;  %v3303_v9 = vld [vmem:[%s3277_s12 + $0x20] sm:$0xff]  ;;  %v3310_v12 = vld [vmem:[%s3277_s12 + $0x38] sm:$0xff]  ;;  %s295_s5 = sadd.s32 %s2505_s30, %s2504_s27 }
  0x20   : > { %998 = vmax.xlane.f32.xlu1 %v997_v3  ;;  %992 = vmax.xlane.f32.xlu0 %v991_v4  ;;  %v994_v7 = vsel %vm990_vm0, %v3293_v5, -inf  ;;  %v3300_v8 = vld [vmem:[%s3277_s12 + $0x28] sm:$0xff]  ;;  %v1003_v11 = vsel %vm990_vm0, %v3303_v9, -inf  ;;  %v3313_v13 = vld [vmem:[%s3277_s12 + $0x30] sm:$0xff]  ;;  %v1012_v14 = vsel %vm990_vm0, %v3310_v12, -inf  ;;  %v3323_v17 = vld [vmem:[%s3277_s12 + $0x40] sm:$0xff] }
  0x21   : > { %v1006_v10 = vsel %vm990_vm0, %v3300_v8, -inf  ;;  %v1009_v15 = vsel %vm990_vm0, %v3313_v13, -inf  ;;  %v3320_v16 = vld [vmem:[%s3277_s12 + $0x48] sm:$0xff]  ;;  %v1015_v19 = vsel %vm990_vm0, %v3323_v17, -inf  ;;  %v3330_v20 = vld [vmem:[%s3277_s12 + $0x50] sm:$0xff]  ;;  %v3333_v21 = vld [vmem:[%s3277_s12 + $0x58] sm:$0xff] }
  0x22   : > { %v1018_v18 = vsel %vm990_vm0, %v3320_v16, -inf  ;;  %v1021_v22 = vsel %vm990_vm0, %v3330_v20, -inf  ;;  %v1024_v23 = vsel %vm990_vm0, %v3333_v21, -inf  ;;  %v3340_v24 = vld [vmem:[%s3277_s12 + $0x60] sm:$0xff]  ;;  %v3343_v25 = vld [vmem:[%s3277_s12 + $0x68] sm:$0xff]  ;;  %v3350_v28 = vld [vmem:[%s3277_s12 + $0x70] sm:$0xff] }
  0x23   : > { %v1027_v26 = vsel %vm990_vm0, %v3340_v24, -inf  ;;  %v1030_v27 = vsel %vm990_vm0, %v3343_v25, -inf  ;;  %v3353_v29 = vld [vmem:[%s3277_s12 + $0x78] sm:$0xff]  ;;  %v1033_v30 = vsel %vm990_vm0, %v3350_v28, -inf  ;;  %v3360_v32 = vld [vmem:[%s3277_s12 + $0x80] sm:$0xff]  ;;  %v3363_v33 = vld [vmem:[%s3277_s12 + $0x88] sm:$0xff] }
  0x24   : > { %1001 = vmax.xlane.f32.xlu1 %v1000_v6  ;;  %995 = vmax.xlane.f32.xlu0 %v994_v7  ;;  %v1036_v31 = vsel %vm990_vm0, %v3353_v29, -inf  ;;  %v1039_v34 = vsel %vm990_vm0, %v3360_v32, -inf  ;;  %v1042_v35 = vsel %vm990_vm0, %v3363_v33, -inf  ;;  %v3370_v36 = vld [vmem:[%s3277_s12 + $0x90] sm:$0xff]  ;;  %v3373_v37 = vld [vmem:[%s3277_s12 + $0x98] sm:$0xff]  ;;  %v3380_v40 = vld [vmem:[%s3277_s12 + $0xa0] sm:$0xff] }
  0x25   : > { %v1045_v38 = vsel %vm990_vm0, %v3370_v36, -inf  ;;  %v1048_v39 = vsel %vm990_vm0, %v3373_v37, -inf  ;;  %v3383_v41 = vld [vmem:[%s3277_s12 + $0xa8] sm:$0xff]  ;;  %v1051_v42 = vsel %vm990_vm0, %v3380_v40, -inf  ;;  %v3397_v44 = vld [vmem:[%s3277_s12 + $0xb0] sm:$0xff]  ;;  %v3400_v45 = vld [vmem:[%s3277_s12 + $0xd8] sm:$0xff] }
  0x26   : > { %v1054_v43 = vsel %vm990_vm0, %v3383_v41, -inf  ;;  %4282 = vst [vmem:[#allocation5_spill] sm:$0xff] %v3400_v45  ;;  %v3403_v46 = vld [vmem:[%s3390_s23 + $0x8] sm:$0xff]  ;;  %v1057_v47 = vsel %vm990_vm0, %v3397_v44, -inf  ;;  %v1072_v48 = vsel %vm990_vm0, %v3400_v45, -inf  ;;  %v3412_v50 = vld [vmem:[%s3277_s12 + $0xb8] sm:$0xff] }
  0x27   : > { %v375_v49 = vmul.f32 %v3403_v46, %v3403_v46  ;;  %v1060_v51 = vsel %vm990_vm0, %v3412_v50, -inf  ;;  %v3418_v53 = vld [vmem:[%s3277_s12 + $0xc0] sm:$0xff]  ;;  %v3423_v55 = vld [vmem:[%s3277_s12 + $0xc8] sm:$0xff]  ;;  %v3428_v57 = vld [vmem:[%s3277_s12 + $0xd0] sm:$0xff]  ;;  %s2506_s6 = sshll.u32 %s295_s5, 3  ;;  %s2500_s14 = sshll.u32 %s3451_s24, 4 }
  0x28   : > { %1007 = vmax.xlane.f32.xlu1 %v1006_v10  ;;  %1004 = vmax.xlane.f32.xlu0 %v1003_v11  ;;  %v1063_v54 = vsel %vm990_vm0, %v3418_v53, -inf  ;;  %v1066_v56 = vsel %vm990_vm0, %v3423_v55, -inf  ;;  %v3431_v58 = vld [vmem:[%s3390_s23] sm:$0xff]  ;;  %v1069_v59 = vsel %vm990_vm0, %v3428_v57, -inf  ;;  %v3442_v63 = vld [vmem:[%s3390_s23 + $0x10] sm:$0xff]  ;;  %s297_s11 = scalar_lea.vmem %s4262_s3, %s2506_s6  ;;  %s281_s27 = sadd.s32 %s2500_s14, %s2499_s13 }
  0x29   : > { %v410_v52 = vsel %vm406_vm1, %v375_v49, 0.0  ;;  %v374_v60 = vmul.f32 %v3431_v58, %v3431_v58  ;;  %v3439_v62 = vld [vmem:[%s3277_s12 + $0xe0] sm:$0xff]  ;;  %4284 = vst [vmem:[#allocation7_spill] sm:$0xff] %v3442_v63  ;;  %v376_v4 = vmul.f32 %v3442_v63, %v3442_v63  ;;  %v371_v7 = vld [vmem:[%s297_s11 + $0x8] sm:$0xff]  ;;  %v373_v10 = vld [vmem:[%s297_s11 + $0x18] sm:$0xff]  ;;  %s2501_s30 = sshll.u32 %s281_s27, 3 }
  0x2a   : > { %4283 = vst [vmem:[#allocation6_spill] sm:$0xff] %v3439_v62  ;;  %v1075_v3 = vsel %vm990_vm0, %v3439_v62, -inf  ;;  %v1382_v11 = vmax.f32 %v371_v7, %v373_v10  ;;  %s283_s9 = scalar_lea.vmem %s4260_s1, %s2501_s30  ;;  %s267_s8 = sand.u32 1, %s3142_s16  }
  0x2b   : > { %v407_v61 = vsel %vm406_vm1, %v374_v60, 0.0  ;;  %v413_v6 = vsel %vm406_vm1, %v376_v4, 0.0  ;;  %v3477_v60 = vld [vmem:[%s283_s9 + $0x18] sm:$0xff]  ;;  %v3483_v4 = vld [vmem:[%s283_s9] sm:$0xff]  ;;  %s2637_s24 = sshll.u32 %s3150_s18, 2  ;;  %s2348_s18 = scalar_lea.sflag [#allocation3], %s267_s8 }
  0x2c   : > { %1013 = vmax.xlane.f32.xlu1 %v1012_v14  ;;  %1010 = vmax.xlane.f32.xlu0 %v1009_v15  ;;  %v370_v14 = vld [vmem:[%s297_s11] sm:$0xff]  ;;  %v372_v15 = vld [vmem:[%s297_s11 + $0x10] sm:$0xff]  ;;  %s3170_s6 = smov [#allocation2]  }
  0x30   : > { %1019 = vmax.xlane.f32.xlu1 %v1018_v18  ;;  %1016 = vmax.xlane.f32.xlu0 %v1015_v19  ;;  %v1375_v18 = vmax.f32 %v370_v14, %v372_v15  ;;  %v1383_v19 = vrot.slane %v1382_v11, 4 }
  0x34   : > { %1022 = vmax.xlane.f32.xlu0 %v1021_v22  ;;  %1025 = vmax.xlane.f32.xlu1 %v1024_v23  ;;  %v1376_v22 = vrot.slane %v1375_v18, 4  ;;  %v1384_v23 = vmax.f32 %v1382_v11, %v1383_v19  ;;  %v3497_v19 = vld [vmem:[%s283_s9 + $0x38] sm:$0xff] }
  0x38   : > { %1028 = vmax.xlane.f32.xlu0 %v1027_v26  ;;  %1031 = vmax.xlane.f32.xlu1 %v1030_v27  ;;  %v1377_v26 = vmax.f32 %v1375_v18, %v1376_v22  ;;  %v1385_v27 = vrot.slane %v1384_v23, 2  ;;  %v3495_v18 = vld [vmem:[%s283_s9 + $0x20] sm:$0xff] }
  0x39   : > { %v571_v22 = vmul.f32 %v3495_v18, %v3495_v18 }
  0x3c   : > { %1034 = vmax.xlane.f32.xlu0 %v1033_v30  ;;  %1037 = vmax.xlane.f32.xlu1 %v1036_v31  ;;  %v1378_v30 = vrot.slane %v1377_v26, 2  ;;  %v1386_v31 = vmax.f32 %v1384_v23, %v1385_v27 }
  0x40   : > { %1040 = vmax.xlane.f32.xlu0 %v1039_v34  ;;  %1043 = vmax.xlane.f32.xlu1 %v1042_v35  ;;  %v1379_v34 = vmax.f32 %v1377_v26, %v1378_v30  ;;  %v1387_v35 = vrot.slane %v1386_v31, 1  ;;  %v574_v26 = vmul.f32 %v3497_v19, %v3497_v19  ;;  %v3503_v30 = vld [vmem:[%s283_s9 + $0x30] sm:$0xff] }
  0x44   : > { %1046 = vmax.xlane.f32.xlu0 %v1045_v38  ;;  %1049 = vmax.xlane.f32.xlu1 %v1048_v39  ;;  %v1380_v38 = vrot.slane %v1379_v34, 1  ;;  %v1388_v39 = vmax.f32 %v1386_v31, %v1387_v35 }
  0x48   : > { %1052 = vmax.xlane.f32.xlu0 %v1051_v42  ;;  %1055 = vmax.xlane.f32.xlu1 %v1054_v43  ;;  %v1381_v42 = vmax.f32 %v1379_v34, %v1380_v38  ;;  %v3458_v43 = vsub.f32 %v371_v7, %v1388_v39  ;;  %v3487_v7 = vld [vmem:[%s283_s9 + $0x28] sm:$0xff]  ;;  %v573_v34 = vmul.f32 %v3503_v30, %v3503_v30 }
  0x4a   : > { %v3464_v49 = vsub.f32 %v372_v15, %v1381_v42 }
  0x4c   : > { %1058 = vmax.xlane.f32.xlu0 %v1057_v47  ;;  %1073 = vmax.xlane.f32.xlu1 %v1072_v48  ;;  %v3460_v47 = vsub.f32 %v373_v10, %v1388_v39  ;;  %v3462_v48 = vsub.f32 %v370_v14, %v1381_v42  ;;  %v567_v10 = vmul.f32 %v3483_v4, %v3483_v4 }
  0x4d   : > { %v572_v14 = vmul.f32 %v3487_v7, %v3487_v7 }
  0x50   : > { %1061 = vmax.xlane.f32.xlu0 %v1060_v51  ;;  %411 = vadd.xlane.f32.xlu1 %v410_v52  ;;  %v1395_v51 = vmul.f32 1.442695, %v3458_v43  ;;  %v1399_v52 = vmul.f32 1.442695, %v3460_v47 }
  0x52   : > { %2728 = vpow2.f32 %v1395_v51 }
  0x53   : > { %2730 = vpow2.f32 %v1399_v52 }
  0x54   : > { %1064 = vmax.xlane.f32.xlu0 %v1063_v54  ;;  %v1393_v54 = vmul.f32 1.442695, %v3462_v48 }
  0x56   : > { %2732 = vpow2.f32 %v1393_v54 }
  0x58   : > { %1067 = vmax.xlane.f32.xlu0 %v1066_v56  ;;  %v1397_v56 = vmul.f32 1.442695, %v3464_v49 }
  0x5a   : > { %2734 = vpow2.f32 %v1397_v56 }
  0x5c   : > { %1070 = vmax.xlane.f32.xlu0 %v1069_v59  ;;  %v3475_v59 = vld [vmem:[%s283_s9 + $0x8] sm:$0xff]  ;;  %v2729_v31 = vpop.eup %2728 }
  0x5d   : > { %v2731_v38 = vpop.eup %2730 }
  0x5e   : > { %v1408_v56 = vadd.f32 %v2731_v38, %v2729_v31 }
  0x60   : > { %408 = vadd.xlane.f32.xlu0 %v407_v61  ;;  %v568_v61 = vmul.f32 %v3475_v59, %v3475_v59  ;;  %v2733_v42 = vpop.eup %2732 }
  0x64   : > { %1076 = vmax.xlane.f32.xlu0 %v1075_v3  ;;  %v570_v3 = vmul.f32 %v3477_v60, %v3477_v60 }
  0x66   : > { %v584_v15 = vadd.f32 %v570_v3, %v568_v61  ;;  %v2735_v61 = vpop.eup %2734 }
  0x67   : > { %v1401_v62 = vadd.f32 %v2735_v61, %v2733_v42 }
  0x68   : > { %414 = vadd.xlane.f32.xlu0 %v413_v6  ;;  %v3485_v6 = vld [vmem:[%s283_s9 + $0x10] sm:$0xff]  ;;  %v585_v27 = vadd.f32 %v584_v15, %v572_v14  ;;  %v1409_v15 = vrot.slane %v1408_v56, 4  ;;  %s3076_s9 = sshll.u32 %s3170_s6, 4  ;;  %s3077_s9 = int_to_ptr.vmem [resolvable:$false] %s3076_s9 }
  0x69   : > { %v569_v11 = vmul.f32 %v3485_v6, %v3485_v6 }
  0x6a   : > { %v586_v39 = vadd.f32 %v585_v27, %v574_v26  ;;  %v1410_v63 = vadd.f32 %v1409_v15, %v1408_v56 }
  0x6b   : > { %v575_v23 = vadd.f32 %v569_v11, %v567_v10 }
  0x6c   : > { %v587_v11 = vrot.slane %v586_v39, 4  ;;  %v1411_v42 = vrot.slane %v1410_v63, 2 }
  0x6d   : > { %v576_v35 = vadd.f32 %v575_v23, %v571_v22 }
  0x6e   : > { %v588_v23 = vadd.f32 %v587_v11, %v586_v39 }
  0x6f   : > { %v577_v54 = vadd.f32 %v576_v35, %v573_v34  ;;  %v1402_v34 = vrot.slane %v1401_v62, 4 }
  0x70   : > { %v589_v35 = vrot.slane %v588_v23, 2 }
  0x71   : > { %v578_v14 = vrot.slane %v577_v54, 4  ;;  %v1403_v39 = vadd.f32 %v1402_v34, %v1401_v62 }
  0x73   : > { %v579_v45 = vadd.f32 %v578_v14, %v577_v54  ;;  %v590_v54 = vadd.f32 %v589_v35, %v588_v23  ;;  %v1412_v14 = vadd.f32 %v1411_v42, %v1410_v63  ;;  %v1404_v62 = vrot.slane %v1403_v39, 2 }
  0x75   : > { %v580_v38 = vrot.slane %v579_v45, 2  ;;  %v591_v15 = vrot.slane %v590_v54, 1  ;;  %v1405_v35 = vadd.f32 %v1404_v62, %v1403_v39 }
  0x77   : > { %v581_v56 = vadd.f32 %v580_v38, %v579_v45  ;;  %v592_v23 = vadd.f32 %v591_v15, %v590_v54 }
  0xad   : > { %v999_v51 = vpop.xlane.xlu1 %998  ;;  %v993_v52 = vpop.xlane.xlu0 %992 }
  0xae   : > { %v3508_v3 = vsub.f32 %v3280_v0, %v999_v51  ;;  %v3511_v10 = vsub.f32 %v3283_v1, %v993_v52 }
  0xb0   : > { %v1119_v22 = vmul.f32 1.442695, %v3511_v10  ;;  %v1123_v31 = vmul.f32 1.442695, %v3508_v3 }
  0xb1   : > { %v1002_v26 = vpop.xlane.xlu1 %1001  ;;  %v996_v27 = vpop.xlane.xlu0 %995 }
  0xb2   : > { %v3516_v0 = vsub.f32 %v3286_v2, %v1002_v26  ;;  %v3519_v1 = vsub.f32 %v3293_v5, %v996_v27  ;;  %2736 = vpow2.f32 %v1119_v22  ;;  %v582_v22 = vrot.slane %v581_v56, 1 }
  0xb3   : > { %2738 = vpow2.f32 %v1123_v31 }
  0xb4   : > { %v1121_v51 = vmul.f32 1.442695, %v3519_v1  ;;  %v1125_v11 = vmul.f32 1.442695, %v3516_v0  ;;  %v583_v45 = vadd.f32 %v582_v22, %v581_v56 }
  0xb5   : > { %v1008_v52 = vpop.xlane.xlu1 %1007  ;;  %v1005_v61 = vpop.xlane.xlu0 %1004 }
  0xb6   : > { %v3524_v2 = vsub.f32 %v3300_v8, %v1008_v52  ;;  %2740 = vpow2.f32 %v1121_v51  ;;  %v3527_v5 = vsub.f32 %v3303_v9, %v1005_v61  ;;  %v1413_v8 = vrot.slane %v1412_v14, 1 }
  0xb7   : > { %v1406_v52 = vrot.slane %v1405_v35, 1 }
  0xb8   : > { %v1129_v26 = vmul.f32 1.442695, %v3524_v2  ;;  %v1127_v63 = vmul.f32 1.442695, %v3527_v5 }
  0xb9   : > { %v1014_v27 = vpop.xlane.xlu1 %1013  ;;  %v1011_v34 = vpop.xlane.xlu0 %1010  ;;  %v1407_v56 = vadd.f32 %v1406_v52, %v1405_v35 }
  0xba   : > { %2742 = vpow2.f32 %v1129_v26  ;;  %v3531_v31 = vsub.f32 %v3310_v12, %v1014_v27  ;;  %v1414_v12 = vadd.f32 %v1413_v8, %v1412_v14  ;;  %v3540_v39 = vsub.f32 %v3313_v13, %v1011_v34 }
  0xbb   : > { %2744 = vpow2.f32 %v1125_v11 }
  0xbc   : > { %v1133_v9 = vmul.f32 1.442695, %v3531_v31  ;;  %2746 = vrsqrt.f32 %v592_v23  ;;  %v2737_v38 = vpop.eup %2736  ;;  %v3550_v23 = vld [vmem:[%s3277_s12 + $0xf0] sm:$0xff] }
  0xbd   : > { %v1020_v42 = vpop.xlane.xlu1 %1019  ;;  %v1017_v51 = vpop.xlane.xlu0 %1016  ;;  %2748 = vrsqrt.f32 %v583_v45  ;;  %v1183_v61 = vsel %vm990_vm0, %v2737_v38, 0.0 }
  0xbe   : > { %2750 = vpow2.f32 %v1133_v9  ;;  %v3537_v54 = vsub.f32 %v3320_v16, %v1020_v42  ;;  %1184 = vadd.xlane.f32.xlu1 %v1183_v61  ;;  %v2739_v11 = vpop.eup %2738  ;;  %v1131_v16 = vmul.f32 1.442695, %v3540_v39  ;;  %v3561_v42 = vld [vmem:[%s3390_s23 + $0x20] sm:$0xff]  ;;  %v1081_v61 = vsel %vm990_vm0, %v3550_v23, -inf }
  0xbf   : > { %2752 = vpow2.f32 %v1127_v63  ;;  %v1189_v34 = vsel %vm990_vm0, %v2739_v11, 0.0 }
  0xc0   : > { %v2741_v15 = vpop.eup %2740  ;;  %v1137_v62 = vmul.f32 1.442695, %v3537_v54  ;;  %2754 = vlog2.f32 %v1414_v12 }
  0xc1   : > { %v1023_v22 = vpop.xlane.xlu0 %1022  ;;  %v1186_v26 = vsel %vm990_vm0, %v2741_v15, 0.0  ;;  %v1026_v14 = vpop.xlane.xlu1 %1025  ;;  %2756 = vlog2.f32 %v1407_v56  ;;  %v378_v15 = vmul.f32 %v3561_v42, %v3561_v42 }
  0xc2   : > { %v3545_v27 = vsub.f32 %v3330_v20, %v1023_v22  ;;  %1187 = vadd.xlane.f32.xlu1 %v1186_v26  ;;  %2758 = vpow2.f32 %v1137_v62  ;;  %v3554_v20 = vsub.f32 %v3323_v17, %v1017_v51  ;;  %v3558_v38 = vsub.f32 %v3333_v21, %v1026_v14 }
  0xc3   : > { %2760 = vpow2.f32 %v1131_v16 }
  0xc4   : > { %v2743_v13 = vpop.eup %2742  ;;  %v1139_v9 = vmul.f32 1.442695, %v3545_v27  ;;  %v1135_v16 = vmul.f32 1.442695, %v3554_v20  ;;  %v1141_v14 = vmul.f32 1.442695, %v3558_v38 }
  0xc5   : > { %v2745_v45 = vpop.eup %2744  ;;  %v1198_v8 = vsel %vm990_vm0, %v2743_v13, 0.0  ;;  %v1029_v63 = vpop.xlane.xlu0 %1028 }
  0xc6   : > { %v2747_v35 = vpop.eup %2746  ;;  %1199 = vadd.xlane.f32.xlu0 %v1198_v8  ;;  %1190 = vadd.xlane.f32.xlu1 %v1189_v34  ;;  %v1192_v11 = vsel %vm990_vm0, %v2745_v45, 0.0  ;;  %v1032_v22 = vpop.xlane.xlu1 %1031  ;;  %2762 = vpow2.f32 %v1139_v9  ;;  %v3573_v13 = vsub.f32 %v3340_v24, %v1029_v63  ;;  %v3585_v63 = vld [vmem:[%s3277_s12 + $0xe8] sm:$0xff] }
  0xc7   : > { %v2749_v52 = vpop.eup %2748  ;;  %v596_v12 = vmin.f32 %v2747_v35, 1e+10  ;;  %2764 = vpow2.f32 %v1141_v14  ;;  %v3598_v14 = vld [vmem:[%s3390_s23 + $0x18] sm:$0xff] }
  0xc8   : > { %v2751_v56 = vpop.eup %2750  ;;  %v595_v17 = vmin.f32 %v2749_v52, 1e+10  ;;  %v3580_v52 = vsub.f32 %v3343_v25, %v1032_v22  ;;  %v1143_v25 = vmul.f32 1.442695, %v3573_v13  ;;  %2766 = vpow2.f32 %v1135_v16 }
  0xc9   : > { %v2753_v51 = vpop.eup %2752  ;;  %v1035_v21 = vpop.xlane.xlu0 %1034  ;;  %v630_v26 = vmul.f32 %v596_v12, %v3475_v59  ;;  %v632_v62 = vmul.f32 %v596_v12, %v3477_v60  ;;  %v1204_v34 = vsel %vm990_vm0, %v2751_v56, 0.0  ;;  %v634_v9 = vmul.f32 %v596_v12, %v3487_v7 }
  0xca   : > { %1082 = vmax.xlane.f32.xlu0 %v1081_v61  ;;  %1193 = vadd.xlane.f32.xlu1 %v1192_v11  ;;  %v629_v8 = vmul.f32 %v595_v17, %v3483_v4  ;;  %v631_v59 = vmul.f32 %v595_v17, %v3485_v6  ;;  %v2755_v35 = vpop.eup %2754  ;;  %v1195_v60 = vsel %vm990_vm0, %v2753_v51, 0.0  ;;  %v636_v61 = vmul.f32 %v596_v12, %v3497_v19 }
  0xcb   : > { %v2643_v45 = vpack.c.bf16 %v632_v62, %v630_v26  ;;  %v2757_v24 = vpop.eup %2756  ;;  %v633_v4 = vmul.f32 %v595_v17, %v3495_v18  ;;  %v635_v6 = vmul.f32 %v595_v17, %v3503_v30  ;;  %v419_v51 = vsel %vm406_vm1, %v378_v15, 0.0 }
  0xcc   : > { %v2645_v56 = vpack.c.bf16 %v631_v59, %v629_v8  ;;  %v2647_v7 = vpack.c.bf16 %v636_v61, %v634_v9  ;;  %v1418_v12 = vmul.f32 0.6931472, %v2755_v35  ;;  %v2759_v22 = vpop.eup %2758  ;;  %v1078_v26 = vsel %vm990_vm0, %v3585_v63, -inf }
  0xcd   : > { %v1041_v11 = vpop.xlane.xlu0 %1040  ;;  %2644 = vmatprep.subr.bf16.mxu0 %v2643_v45  ;;  %v2649_v19 = vpack.c.bf16 %v635_v6, %v633_v4  ;;  %v1145_v18 = vmul.f32 1.442695, %v3580_v52  ;;  %v1416_v30 = vmul.f32 0.6931472, %v2757_v24  ;;  %v2761_v17 = vpop.eup %2760  ;;  %v3595_v62 = vsub.f32 %v3350_v28, %v1035_v21 }
  0xce   : > { %1205 = vadd.xlane.f32.xlu0 %v1204_v34  ;;  %1196 = vadd.xlane.f32.xlu1 %v1195_v60  ;;  %v3603_v16 = vsub.f32 %v3458_v43, %v1418_v12  ;;  %v3606_v34 = vsub.f32 %v3460_v47, %v1418_v12  ;;  %2768 = vpow2.f32 %v1143_v25  ;;  %v4267_v45 = vmov 0.0   ;;  %v1038_v21 = vpop.xlane.xlu1 %1037 }
  0xcf   : > { %2646 = vmatpush1.bf16.msra.mxu0 %v2645_v56  ;;  %797 = vmatprep.mubr.f32.mxu0 %v4267_v45  ;;  %v1210_v28 = vsel %vm990_vm0, %v2759_v22, 0.0  ;;  %v3612_v59 = vsub.f32 %v3462_v48, %v1416_v30  ;;  %v1201_v35 = vsel %vm990_vm0, %v2761_v17, 0.0  ;;  %v377_v47 = vmul.f32 %v3598_v14, %v3598_v14  ;;  %v3644_v17 = vld [vmem:[%s3390_s23 + $0x28] sm:$0xff] }
  0xd0   : > { %2648 = vmatprep.subr.bf16.mxu0 %v2647_v7  ;;  %v1425_v8 = vmul.f32 1.442695, %v3603_v16  ;;  %v2763_v43 = vpop.eup %2762  ;;  %v1429_v60 = vmul.f32 1.442695, %v3606_v34  ;;  %v3619_v9 = vsub.f32 %v3464_v49, %v1416_v30  ;;  %1609 = vmatprep.mubr.f32.mxu1 %v4267_v45  ;;  %2770 = vpow2.f32 %v1145_v18  ;;  %v3641_v30 = vld [vmem:[%s3277_s12 + $0xf8] sm:$0xff]  ;;  %v3759_v45 = vld [vmem:[%s3390_s23 + $0x68] sm:$0xff] }
  0xd1   : > { %v3600_v15 = vpop.xlane.xlu0 %1046  ;;  %v1147_v61 = vmul.f32 1.442695, %v3595_v62  ;;  %v3626_v48 = vsub.f32 %v3353_v29, %v1038_v21  ;;  %v1423_v56 = vmul.f32 1.442695, %v3612_v59  ;;  %v1213_v4 = vsel %vm990_vm0, %v2763_v43, 0.0  ;;  %v2765_v6 = vpop.eup %2764  ;;  %s2496_s12 = sshll.u32 %s267_s8, 1 }
  0xd2   : > { %420 = vadd.xlane.f32.xlu0 %v419_v51  ;;  %1079 = vmax.xlane.f32.xlu1 %v1078_v26  ;;  %2772 = vpow2.f32 %v1425_v8  ;;  %v416_v49 = vsel %vm406_vm1, %v377_v47, 0.0  ;;  %v1427_v25 = vmul.f32 1.442695, %v3619_v9  ;;  %v2767_v51 = vpop.eup %2766  ;;  %v1044_v12 = vpop.xlane.xlu1 %1043  ;;  %v1216_v22 = vsel %vm990_vm0, %v2765_v6, 0.0  ;;  %s269_s13 = scalar_lea.vmem [#allocation2], %s2496_s12  ;;  %s3078_s12 = scalar_lea.vmem %s3077_s9, 64 }
  0xd3   : > { %2650 = vmatpush1.bf16.msra.mxu0 %v2649_v19  ;;  %2774 = vpow2.f32 %v1429_v60  ;;  %v1149_v29 = vmul.f32 1.442695, %v3626_v48  ;;  %v3636_v19 = vsub.f32 %v3360_v32, %v1041_v11  ;;  %v1207_v18 = vsel %vm990_vm0, %v2767_v51, 0.0  ;;  %s2364_s14 = sshll.u32 %s269_s13, 4  ;;  %s4208_s14 = int_to_ptr.vmem [resolvable:$true] %s2364_s14 }
  0xd4   : > { %2776 = vpow2.f32 %v1147_v61  ;;  %v3650_v11 = vsub.f32 %v3363_v33, %v1044_v12  ;;  %v1084_v47 = vsel %vm990_vm0, %v3641_v30, -inf  ;;  %v379_v60 = vmul.f32 %v3644_v17, %v3644_v17  ;;  %v3658_v61 = vld [vmem:[%s3390_s23 + $0x30] sm:$0xff]  ;;  %p3079_p4 = scmp.lt.s32.totalorder %s4208_s14, %s3077_s9 }
  0xd5   : > { %v3623_v24 = vpop.xlane.xlu0 %1052  ;;  %2778 = vpow2.f32 %v1423_v56  ;;  %v1151_v32 = vmul.f32 1.442695, %v3636_v19  ;;  %v3665_v6 = vsub.f32 %v3370_v36, %v3600_v15 }
  0xd6   : > { %1211 = vadd.xlane.f32.xlu0 %v1210_v28  ;;  %1202 = vadd.xlane.f32.xlu1 %v1201_v35  ;;  %2780 = vpow2.f32 %v1427_v25  ;;  %v1050_v21 = vpop.xlane.xlu1 %1049  ;;  %v1153_v33 = vmul.f32 1.442695, %v3650_v11 }
  0xd7   : > { %2782 = vpow2.f32 %v1149_v29 }
  0xd8   : > { %v2769_v26 = vpop.eup %2768  ;;  %2784 = vpow2.f32 %v1151_v32  ;;  %v380_v32 = vmul.f32 %v3658_v61, %v3658_v61 }
  0xd9   : > { %v3632_v7 = vpop.xlane.xlu0 %1058  ;;  %v1219_v43 = vsel %vm990_vm0, %v2769_v26, 0.0  ;;  %2786 = vpow2.f32 %v1153_v33 }
  0xda   : > { %1214 = vadd.xlane.f32.xlu0 %v1213_v4  ;;  %417 = vadd.xlane.f32.xlu1 %v416_v49  ;;  %v2771_v8 = vpop.eup %2770  ;;  %v1056_v49 = vpop.xlane.xlu1 %1055 }
  0xdb   : > { %v1222_v29 = vsel %vm990_vm0, %v2771_v8, 0.0  ;;  %v3682_v8 = vsub.f32 %v3373_v37, %v1050_v21 }
  0xdc   : > { %v2773_v35 = vpop.eup %2772 }
  0xdd   : > { %v3646_v28 = vpop.xlane.xlu0 %1061  ;;  %v2775_v4 = vpop.eup %2774  ;;  %v1432_v25 = vmul.f32 %v2773_v35, %v3603_v16 }
  0xde   : > { %1217 = vadd.xlane.f32.xlu0 %v1216_v22  ;;  %1208 = vadd.xlane.f32.xlu1 %v1207_v18  ;;  %v2777_v51 = vpop.eup %2776  ;;  %v1434_v12 = vmul.f32 %v2775_v4, %v3606_v34  ;;  %v2651_v22 = vpack.c.bf16 %v2775_v4, %v2773_v35  ;;  %v422_v18 = vsel %vm406_vm1, %v379_v60, 0.0  ;;  %v1155_v34 = vmul.f32 1.442695, %v3665_v6  ;;  %v3684_v35 = vpop.xlane.xlu1 %1073 }
  0xdf   : > { %v2779_v26 = vpop.eup %2778  ;;  %v1225_v60 = vsel %vm990_vm0, %v2777_v51, 0.0 }
  0xe0   : > { %v3678_v15 = vadd.f32 %v1434_v12, %v1432_v25  ;;  %2652 = vmatprep.subr.bf16.mxu1 %v2651_v22  ;;  %v2781_v16 = vpop.eup %2780  ;;  %v425_v22 = vsel %vm406_vm1, %v380_v32, 0.0  ;;  %2788 = vpow2.f32 %v1155_v34 }
  0xe1   : > { %v3660_v56 = vpop.xlane.xlu0 %1064  ;;  %v1433_v4 = vmul.f32 %v2781_v16, %v3619_v9  ;;  %v2653_v25 = vpack.c.bf16 %v2781_v16, %v2779_v26  ;;  %v2783_v12 = vpop.eup %2782  ;;  %v3702_v9 = vsub.f32 %v3380_v40, %v3623_v24  ;;  %v3713_v24 = vsub.f32 %v3383_v41, %v1056_v49 }
  0xe2   : > { %1220 = vadd.xlane.f32.xlu0 %v1219_v43  ;;  %1085 = vmax.xlane.f32.xlu1 %v1084_v47  ;;  %v3674_v43 = vld [vmem:[%s3390_s23 + $0x38] sm:$0xff]  ;;  %4285 = vst [vmem:[#allocation8_spill] sm:$0xff] %v3678_v15  ;;  %v1431_v47 = vmul.f32 %v2779_v26, %v3612_v59  ;;  %v1157_v59 = vmul.f32 1.442695, %v3682_v8  ;;  %v412_v51 = vpop.xlane.xlu1 %411  ;;  %v1228_v26 = vsel %vm990_vm0, %v2783_v12, 0.0  ;;  %v3875_v15 = vld [vmem:[%s3390_s23 + $0xd0] sm:$0xff] }
  0xe3   : > { %v381_v33 = vmul.f32 %v3674_v43, %v3674_v43  ;;  %2654 = vmatpush1.bf16.msra.mxu1 %v2653_v25  ;;  %2790 = vrsqrt.f32 %v412_v51  ;;  %v1159_v40 = vmul.f32 1.442695, %v3702_v9  ;;  %v1161_v41 = vmul.f32 1.442695, %v3713_v24  ;;  %4297 = vst [vmem:[#allocation13_spill] sm:$0xff] %v3875_v15 }
  0xe4   : > { %v3697_v21 = vadd.f32 %v1433_v4, %v1431_v47  ;;  %v3709_v47 = vld [vmem:[%s3390_s23 + $0x48] sm:$0xff]  ;;  %2792 = vpow2.f32 %v1157_v59 }
  0xe5   : > { %v3676_v36 = vpop.xlane.xlu0 %1067  ;;  %v428_v32 = vsel %vm406_vm1, %v381_v33, 0.0  ;;  %v383_v12 = vmul.f32 %v3709_v47, %v3709_v47  ;;  %v3724_v33 = vld [vmem:[%s3390_s23 + $0x50] sm:$0xff] }
  0xe6   : > { %1223 = vadd.xlane.f32.xlu0 %v1222_v29  ;;  %423 = vadd.xlane.f32.xlu1 %v422_v18  ;;  %v3693_v29 = vld [vmem:[%s3390_s23 + $0x40] sm:$0xff]  ;;  %4286 = vst [vmem:[#allocation9_spill] sm:$0xff] %v3697_v21  ;;  %v2785_v18 = vpop.eup %2784 }
  0xe7   : > { %v382_v16 = vmul.f32 %v3693_v29, %v3693_v29  ;;  %v2787_v4 = vpop.eup %2786 }
  0xe8   : > { %v1234_v59 = vsel %vm990_vm0, %v2787_v4, 0.0 }
  0xe9   : > { %v3695_v37 = vpop.xlane.xlu0 %1070  ;;  %v431_v25 = vsel %vm406_vm1, %v382_v16, 0.0 }
  0xea   : > { %1226 = vadd.xlane.f32.xlu0 %v1225_v60  ;;  %426 = vadd.xlane.f32.xlu1 %v425_v22  ;;  %v1231_v60 = vsel %vm990_vm0, %v2785_v18, 0.0  ;;  %v3721_v22 = vsub.f32 %v3397_v44, %v3632_v7  ;;  %v2789_v51 = vpop.eup %2788  ;;  %v384_v18 = vmul.f32 %v3724_v33, %v3724_v33  ;;  %v3735_v7 = vld [vmem:[%s3390_s23 + $0x58] sm:$0xff] }
  0xec   : > { %v1163_v44 = vmul.f32 1.442695, %v3721_v22  ;;  %v437_v4 = vsel %vm406_vm1, %v384_v18, 0.0 }
  0xed   : > { %v409_v34 = vpop.xlane.xlu0 %408 }
  0xee   : > { %1229 = vadd.xlane.f32.xlu0 %v1228_v26  ;;  %429 = vadd.xlane.f32.xlu1 %v428_v32  ;;  %2794 = vrsqrt.f32 %v409_v34  ;;  %v434_v26 = vsel %vm406_vm1, %v383_v12, 0.0  ;;  %v3739_v32 = vsub.f32 %v3412_v50, %v3646_v28  ;;  %v2791_v34 = vpop.eup %2790  ;;  %v3751_v28 = vsub.f32 %v3418_v53, %v3660_v56 }
  0xef   : > { %2796 = vpow2.f32 %v1159_v40  ;;  %v1237_v40 = vsel %vm990_vm0, %v2789_v51, 0.0  ;;  %v536_v51 = vmin.f32 %v2791_v34, 1e+10  ;;  %v3764_v56 = vsub.f32 %v3423_v55, %v3676_v36 }
  0xf0   : > { %2798 = vpow2.f32 %v1161_v41  ;;  %v3746_v41 = vld [vmem:[%s3390_s23 + $0x60] sm:$0xff]  ;;  %v1165_v50 = vmul.f32 1.442695, %v3739_v32  ;;  %v1167_v53 = vmul.f32 1.442695, %v3751_v28  ;;  %v3779_v55 = vsub.f32 %v3428_v57, %v3695_v37 }
  0xf1   : > { %v3727_v49 = vpop.xlane.xlu0 %1076  ;;  %v598_v34 = vmul.f32 %v536_v51, %v3403_v46  ;;  %v1169_v46 = vmul.f32 1.442695, %v3764_v56  ;;  %v4289_v37 = vld [vmem:[#allocation5_spill] sm:$0xff] }
  0xf2   : > { %1232 = vadd.xlane.f32.xlu0 %v1231_v60  ;;  %432 = vadd.xlane.f32.xlu1 %v431_v25  ;;  %v2793_v60 = vpop.eup %2792  ;;  %v385_v25 = vmul.f32 %v3735_v7, %v3735_v7  ;;  %v1171_v57 = vmul.f32 1.442695, %v3779_v55 }
  0xf5   : > { %v415_v16 = vpop.xlane.xlu0 %414 }
  0xf6   : > { %1235 = vadd.xlane.f32.xlu0 %v1234_v59  ;;  %435 = vadd.xlane.f32.xlu1 %v434_v26  ;;  %2800 = vrsqrt.f32 %v415_v16  ;;  %v1240_v26 = vsel %vm990_vm0, %v2793_v60, 0.0  ;;  %v440_v16 = vsel %vm406_vm1, %v385_v25, 0.0 }
  0xf7   : > { %2802 = vpow2.f32 %v1163_v44  ;;  %v386_v44 = vmul.f32 %v3746_v41, %v3746_v41 }
  0xf8   : > { %v2795_v12 = vpop.eup %2794  ;;  %2804 = vpow2.f32 %v1165_v50 }
  0xf9   : > { %v535_v59 = vmin.f32 %v2795_v12, 1e+10  ;;  %v2797_v18 = vpop.eup %2796  ;;  %v443_v25 = vsel %vm406_vm1, %v386_v44, 0.0  ;;  %v387_v12 = vmul.f32 %v3759_v45, %v3759_v45  ;;  %2806 = vpow2.f32 %v1167_v53  ;;  %v4288_v44 = vld [vmem:[#allocation7_spill] sm:$0xff] }
  0xfa   : > { %1238 = vadd.xlane.f32.xlu0 %v1237_v40  ;;  %438 = vadd.xlane.f32.xlu1 %v437_v4  ;;  %v1243_v60 = vsel %vm990_vm0, %v2797_v18, 0.0  ;;  %v4287_v4 = vmov 0.0   ;;  %v3789_v53 = vld [vmem:[%s3390_s23 + $0x78] sm:$0xff]  ;;  %2808 = vpow2.f32 %v1169_v46  ;;  %v4291_v46 = vld [vmem:[#allocation6_spill] sm:$0xff] }
  0xfb   : > { %v597_v40 = vmul.f32 %v535_v59, %v3431_v58  ;;  %v2799_v58 = vpop.eup %2798  ;;  %v3774_v59 = vld [vmem:[%s3390_s23 + $0x70] sm:$0xff]  ;;  %v446_v18 = vsel %vm406_vm1, %v387_v12, 0.0  ;;  %v389_v12 = vmul.f32 %v3789_v53, %v3789_v53  ;;  %2810 = vpow2.f32 %v1171_v57 }
  0xfd   : > { %2507 = vmatmul.mubr.msk.f32.vlgmr.msra.gmra.mrb[0].mxu0 %vm406_vm1, %v597_v40 }
  0xfe   : > { %1241 = vadd.xlane.f32.xlu0 %v1240_v26  ;;  %441 = vadd.xlane.f32.xlu1 %v440_v16  ;;  %v1246_v26 = vsel %vm990_vm0, %v2799_v58, 0.0  ;;  %v388_v16 = vmul.f32 %v3774_v59, %v3774_v59 }
  0xff   : > { %803 = vmatprep.mubr.f32.mxu0 %v4287_v4 }
 0x100   : > { %v2801_v50 = vpop.eup %2800 }
 0x101   : > { %v537_v36 = vmin.f32 %v2801_v50, 1e+10  ;;  %2508 = vmatmul.mubr.msk.f32.gmra.mrb[2].mxu0 %vm406_vm1, %v598_v34  ;;  %v2803_v51 = vpop.eup %2802  ;;  %v3794_v34 = vsub.f32 %v4289_v37, %v3684_v35  ;;  %v3803_v50 = vld [vmem:[%s3390_s23 + $0x80] sm:$0xff] }
 0x102   : > { %1244 = vadd.xlane.f32.xlu0 %v1243_v60  ;;  %444 = vadd.xlane.f32.xlu1 %v443_v25  ;;  %v1249_v60 = vsel %vm990_vm0, %v2803_v51, 0.0  ;;  %v2805_v58 = vpop.eup %2804  ;;  %v449_v25 = vsel %vm406_vm1, %v388_v16, 0.0  ;;  %v390_v16 = vmul.f32 %v3803_v50, %v3803_v50 }
 0x103   : > { %809 = vmatprep.mubr.f32.mxu0 %v4287_v4  ;;  %v599_v40 = vmul.f32 %v537_v36, %v4288_v44  ;;  %4290 = vst [vmem:[#allocation7_spill] sm:$0xff] %v3794_v34  ;;  %v1173_v35 = vmul.f32 1.442695, %v3794_v34  ;;  %v3808_v36 = vsub.f32 %v4291_v46, %v3727_v49  ;;  %v1252_v51 = vsel %vm990_vm0, %v2805_v58, 0.0  ;;  %v3815_v44 = vld [vmem:[%s3390_s23 + $0x88] sm:$0xff]  ;;  %v3823_v58 = vld [vmem:[%s3390_s23 + $0x90] sm:$0xff] }
 0x104   : > { %v455_v37 = vsel %vm406_vm1, %v390_v16, 0.0  ;;  %v392_v46 = vmul.f32 %v3823_v58, %v3823_v58 }
 0x105   : > { %2509 = vmatmul.mubr.msk.f32.gmra.mrb[4].mxu0 %vm406_vm1, %v599_v40  ;;  %4292 = vst [vmem:[#allocation5_spill] sm:$0xff] %v3808_v36  ;;  %2812 = vpow2.f32 %v1173_v35  ;;  %v1175_v40 = vmul.f32 1.442695, %v3808_v36 }
 0x106   : > { %1247 = vadd.xlane.f32.xlu0 %v1246_v26  ;;  %447 = vadd.xlane.f32.xlu1 %v446_v18  ;;  %v2807_v26 = vpop.eup %2806  ;;  %v452_v18 = vsel %vm406_vm1, %v389_v12, 0.0  ;;  %v461_v16 = vsel %vm406_vm1, %v392_v46, 0.0 }
 0x107   : > { %815 = vmatprep.mubr.f32.mxu0 %v4287_v4  ;;  %v1255_v49 = vsel %vm990_vm0, %v2807_v26, 0.0  ;;  %v2809_v57 = vpop.eup %2808  ;;  %2814 = vpow2.f32 %v1175_v40 }
 0x108   : > { %v2811_v12 = vpop.eup %2810 }
 0x109   : > { %v1261_v26 = vsel %vm990_vm0, %v2811_v12, 0.0  ;;  %v3844_v12 = vld [vmem:[%s3390_s23 + $0xa8] sm:$0xff] }
 0x10a   : > { %1250 = vadd.xlane.f32.xlu0 %v1249_v60  ;;  %450 = vadd.xlane.f32.xlu1 %v449_v25  ;;  %v391_v60 = vmul.f32 %v3815_v44, %v3815_v44  ;;  %v1258_v25 = vsel %vm990_vm0, %v2809_v57, 0.0 }
 0x10c   : > { %v458_v35 = vsel %vm406_vm1, %v391_v60, 0.0 }
 0x10e   : > { %1253 = vadd.xlane.f32.xlu0 %v1252_v51  ;;  %453 = vadd.xlane.f32.xlu1 %v452_v18  ;;  %v3830_v51 = vld [vmem:[%s3390_s23 + $0x98] sm:$0xff] }
 0x10f   : > { %v2813_v18 = vpop.eup %2812  ;;  %v393_v40 = vmul.f32 %v3830_v51, %v3830_v51 }
 0x110   : > { %v1264_v57 = vsel %vm990_vm0, %v2813_v18, 0.0  ;;  %v3851_v18 = vld [vmem:[%s3390_s23 + $0xb0] sm:$0xff] }
 0x111   : > { %v464_v60 = vsel %vm406_vm1, %v393_v40, 0.0  ;;  %4293 = vst [vmem:[#allocation6_spill] sm:$0xff] %v3851_v18  ;;  %v396_v40 = vmul.f32 %v3851_v18, %v3851_v18 }
 0x112   : > { %1256 = vadd.xlane.f32.xlu0 %v1255_v49  ;;  %456 = vadd.xlane.f32.xlu1 %v455_v37  ;;  %v3837_v49 = vld [vmem:[%s3390_s23 + $0xa0] sm:$0xff]  ;;  %v2815_v37 = vpop.eup %2814 }
 0x116   : > { %1259 = vadd.xlane.f32.xlu0 %v1258_v25  ;;  %459 = vadd.xlane.f32.xlu1 %v458_v35  ;;  %v394_v25 = vmul.f32 %v3837_v49, %v3837_v49  ;;  %v1267_v35 = vsel %vm990_vm0, %v2815_v37, 0.0  ;;  %v473_v37 = vsel %vm406_vm1, %v396_v40, 0.0 }
 0x118   : > { %v467_v46 = vsel %vm406_vm1, %v394_v25, 0.0  ;;  %v3863_v25 = vld [vmem:[%s3390_s23 + $0xc0] sm:$0xff] }
 0x119   : > { %4295 = vst [vmem:[#allocation11_spill] sm:$0xff] %v3863_v25 }
 0x11a   : > { %1262 = vadd.xlane.f32.xlu0 %v1261_v26  ;;  %462 = vadd.xlane.f32.xlu1 %v461_v16  ;;  %v395_v26 = vmul.f32 %v3844_v12, %v3844_v12 }
 0x11c   : > { %v470_v16 = vsel %vm406_vm1, %v395_v26, 0.0  ;;  %v3869_v26 = vld [vmem:[%s3390_s23 + $0xc8] sm:$0xff] }
 0x11d   : > { %4296 = vst [vmem:[#allocation12_spill] sm:$0xff] %v3869_v26  ;;  %v399_v40 = vmul.f32 %v3869_v26, %v3869_v26 }
 0x11e   : > { %1265 = vadd.xlane.f32.xlu0 %v1264_v57  ;;  %465 = vadd.xlane.f32.xlu1 %v464_v60  ;;  %v3857_v57 = vld [vmem:[%s3390_s23 + $0xb8] sm:$0xff] }
 0x11f   : > { %4294 = vst [vmem:[#allocation10_spill] sm:$0xff] %v3857_v57  ;;  %v397_v60 = vmul.f32 %v3857_v57, %v3857_v57  ;;  %v482_v21 = vsel %vm406_vm1, %v399_v40, 0.0  ;;  %v3893_v40 = vld [vmem:[%s3390_s23 + $0xf8] sm:$0xff] }
 0x122   : > { %1268 = vadd.xlane.f32.xlu0 %v1267_v35  ;;  %468 = vadd.xlane.f32.xlu1 %v467_v46  ;;  %v476_v35 = vsel %vm406_vm1, %v397_v60, 0.0  ;;  %v398_v46 = vmul.f32 %v3863_v25, %v3863_v25  ;;  %v3881_v60 = vld [vmem:[%s3390_s23 + $0xd8] sm:$0xff] }
 0x123   : > { %4298 = vst [vmem:[#allocation14_spill] sm:$0xff] %v3881_v60 }
 0x126   : > { %471 = vadd.xlane.f32.xlu1 %v470_v16  ;;  %v479_v16 = vsel %vm406_vm1, %v398_v46, 0.0  ;;  %v3887_v46 = vld [vmem:[%s3390_s23 + $0xe8] sm:$0xff] }
 0x127   : > { %4299 = vst [vmem:[#allocation15_spill] sm:$0xff] %v3887_v46 }
 0x12a   : > { %474 = vadd.xlane.f32.xlu1 %v473_v37  ;;  %v400_v37 = vmul.f32 %v3875_v15, %v3875_v15 }
 0x12c   : > { %v485_v25 = vsel %vm406_vm1, %v400_v37, 0.0 }
 0x12e   : > { %477 = vadd.xlane.f32.xlu1 %v476_v35  ;;  %v401_v35 = vmul.f32 %v3881_v60, %v3881_v60 }
 0x130   : > { %v488_v26 = vsel %vm406_vm1, %v401_v35, 0.0 }
 0x132   : > { %480 = vadd.xlane.f32.xlu1 %v479_v16  ;;  %v403_v16 = vmul.f32 %v3887_v46, %v3887_v46 }
 0x134   : > { %v494_v15 = vsel %vm406_vm1, %v403_v16, 0.0 }
 0x136   : > { %483 = vadd.xlane.f32.xlu1 %v482_v21  ;;  %v405_v21 = vmul.f32 %v3893_v40, %v3893_v40 }
 0x138   : > { %v500_v37 = vsel %vm406_vm1, %v405_v21, 0.0 }
 0x13a   : > { %486 = vadd.xlane.f32.xlu1 %v485_v25 }
 0x13e   : > { %489 = vadd.xlane.f32.xlu1 %v488_v26 }
 0x142   : > { %495 = vadd.xlane.f32.xlu1 %v494_v15 }
 0x146   : > { %501 = vadd.xlane.f32.xlu1 %v500_v37 }
 0x14b   : > { %v1185_v60 = vpop.xlane.xlu1 %1184 }
 0x14c   : > { %2816 = vlog2.f32 %v1185_v60 }
 0x14f   : > { %v1188_v25 = vpop.xlane.xlu1 %1187 }
 0x150   : > { %2818 = vlog2.f32 %v1188_v25 }
 0x153   : > { %v1200_v35 = vpop.xlane.xlu0 %1199  ;;  %v1191_v36 = vpop.xlane.xlu1 %1190 }
 0x154   : > { %2820 = vlog2.f32 %v1191_v36 }
 0x156   : > { %v2817_v46 = vpop.eup %2816 }
 0x157   : > { %v1083_v57 = vpop.xlane.xlu0 %1082  ;;  %v1280_v34 = vmul.f32 0.6931472, %v2817_v46  ;;  %v1194_v26 = vpop.xlane.xlu1 %1193 }
 0x158   : > { %2822 = vlog2.f32 %v1194_v26  ;;  %v3901_v15 = vsub.f32 %v3550_v23, %v1083_v57 }
 0x159   : > { %v1343_v16 = vsub.f32 %v3511_v10, %v1280_v34  ;;  %2824 = vlog2.f32 %v1200_v35 }
 0x15a   : > { %v2819_v18 = vpop.eup %2818  ;;  %v1179_v25 = vmul.f32 1.442695, %v3901_v15 }
 0x15b   : > { %v1206_v21 = vpop.xlane.xlu0 %1205  ;;  %v1282_v37 = vmul.f32 0.6931472, %v2819_v18  ;;  %2539 = vmatmul.mubr.msk.f32.vlgmr.msra.gmra.mrb[0].mxu1 %vm990_vm0, %v1343_v16  ;;  %v1197_v60 = vpop.xlane.xlu1 %1196 }
 0x15c   : > { %2826 = vlog2.f32 %v1197_v60  ;;  %1615 = vmatprep.mubr.f32.mxu1 %v4287_v4 }
 0x15d   : > { %v1344_v36 = vsub.f32 %v3519_v1, %v1282_v37  ;;  %2828 = vpow2.f32 %v1179_v25 }
 0x15e   : > { %v2821_v46 = vpop.eup %2820  ;;  %2830 = vlog2.f32 %v1206_v21 }
 0x15f   : > { %v421_v26 = vpop.xlane.xlu0 %420  ;;  %v1284_v10 = vmul.f32 0.6931472, %v2821_v46  ;;  %2540 = vmatmul.mubr.msk.f32.gmra.mrb[2].mxu1 %vm990_vm0, %v1344_v36  ;;  %v1080_v23 = vpop.xlane.xlu1 %1079 }
 0x160   : > { %v3909_v34 = vsub.f32 %v3585_v63, %v1080_v23  ;;  %1621 = vmatprep.mubr.f32.mxu1 %v4287_v4 }
 0x161   : > { %v1345_v18 = vsub.f32 %v3508_v3, %v1284_v10 }
 0x162   : > { %v2823_v57 = vpop.eup %2822  ;;  %v1177_v35 = vmul.f32 1.442695, %v3909_v34 }
 0x163   : > { %v1212_v1 = vpop.xlane.xlu0 %1211  ;;  %v1286_v16 = vmul.f32 0.6931472, %v2823_v57  ;;  %2541 = vmatmul.mubr.msk.f32.gmra.mrb[4].mxu1 %vm990_vm0, %v1345_v18  ;;  %v1203_v37 = vpop.xlane.xlu1 %1202 }
 0x164   : > { %2832 = vpow2.f32 %v1177_v35  ;;  %1627 = vmatprep.mubr.f32.mxu1 %v4287_v4  ;;  %v2825_v60 = vpop.eup %2824 }
 0x165   : > { %v1346_v63 = vsub.f32 %v3516_v0, %v1286_v16  ;;  %2834 = vlog2.f32 %v1203_v37  ;;  %v1290_v21 = vmul.f32 0.6931472, %v2825_v60 }
 0x166   : > { %v2827_v36 = vpop.eup %2826  ;;  %2836 = vrsqrt.f32 %v421_v26 }
 0x167   : > { %v1215_v3 = vpop.xlane.xlu0 %1214  ;;  %v1288_v46 = vmul.f32 0.6931472, %v2827_v36  ;;  %2542 = vmatmul.mubr.msk.f32.gmra.mrb[6].mxu1 %vm990_vm0, %v1346_v63  ;;  %v418_v25 = vpop.xlane.xlu1 %417  ;;  %v1348_v26 = vsub.f32 %v3524_v2, %v1290_v21 }
 0x168   : > { %2838 = vrsqrt.f32 %v418_v25  ;;  %1633 = vmatprep.mubr.f32.mxu1 %v4287_v4  ;;  %v2829_v57 = vpop.eup %2828 }
 0x169   : > { %v1347_v10 = vsub.f32 %v3527_v5, %v1288_v46  ;;  %v2831_v0 = vpop.eup %2830  ;;  %v1273_v2 = vsel %vm990_vm0, %v2829_v57, 0.0 }
 0x16a   : > { %v1294_v25 = vmul.f32 0.6931472, %v2831_v0 }
 0x16b   : > { %v1218_v23 = vpop.xlane.xlu0 %1217  ;;  %2543 = vmatmul.mubr.msk.f32.gmra.mrb[8].mxu1 %vm990_vm0, %v1347_v10  ;;  %v1209_v18 = vpop.xlane.xlu1 %1208 }
 0x16c   : > { %2840 = vlog2.f32 %v1209_v18  ;;  %1639 = vmatprep.mubr.f32.mxu1 %v4287_v4  ;;  %v1350_v57 = vsub.f32 %v3531_v31, %v1294_v25 }
 0x16d   : > { %2842 = vlog2.f32 %v1212_v1 }
 0x16e   : > { %v2833_v35 = vpop.eup %2832  ;;  %2844 = vlog2.f32 %v1215_v3 }
 0x16f   : > { %v1221_v16 = vpop.xlane.xlu0 %1220  ;;  %v2835_v37 = vpop.eup %2834  ;;  %2544 = vmatmul.mubr.msk.f32.gmra.mrb[10].mxu1 %vm990_vm0, %v1348_v26  ;;  %v1270_v5 = vsel %vm990_vm0, %v2833_v35, 0.0  ;;  %2846 = vlog2.f32 %v1218_v23 }
 0x170   : > { %v1086_v63 = vpop.xlane.xlu1 %1085  ;;  %v2837_v60 = vpop.eup %2836  ;;  %v1292_v36 = vmul.f32 0.6931472, %v2835_v37  ;;  %1271 = vadd.xlane.f32.xlu0 %v1270_v5  ;;  %1645 = vmatprep.mubr.f32.mxu1 %v4287_v4 }
 0x171   : > { %v3926_v46 = vsub.f32 %v3641_v30, %v1086_v63  ;;  %v539_v26 = vmin.f32 %v2837_v60, 1e+10 }
 0x172   : > { %v2839_v1 = vpop.eup %2838  ;;  %v1349_v21 = vsub.f32 %v3540_v39, %v1292_v36 }
 0x173   : > { %v1181_v10 = vmul.f32 1.442695, %v3926_v46  ;;  %v1224_v18 = vpop.xlane.xlu0 %1223  ;;  %v538_v35 = vmin.f32 %v2839_v1, 1e+10  ;;  %v601_v63 = vmul.f32 %v539_v26, %v3561_v42  ;;  %v3944_v42 = vld [vmem:[%s3390_s23 + $0xe0] sm:$0xff] }
 0x174   : > { %v424_v37 = vpop.xlane.xlu1 %423  ;;  %2545 = vmatmul.mubr.msk.f32.gmra.mrb[12].mxu1 %vm990_vm0, %v1349_v21  ;;  %1274 = vadd.xlane.f32.xlu0 %v1273_v2 }
 0x175   : > { %2848 = vpow2.f32 %v1181_v10  ;;  %v600_v30 = vmul.f32 %v538_v35, %v3598_v14  ;;  %1651 = vmatprep.mubr.f32.mxu1 %v4287_v4  ;;  %v402_v10 = vmul.f32 %v3944_v42, %v3944_v42 }
 0x176   : > { %2850 = vrsqrt.f32 %v424_v37  ;;  %v2841_v3 = vpop.eup %2840 }
 0x177   : > { %v1227_v39 = vpop.xlane.xlu0 %1226  ;;  %v2843_v0 = vpop.eup %2842  ;;  %v1296_v5 = vmul.f32 0.6931472, %v2841_v3  ;;  %2510 = vmatmul.mubr.msk.f32.gmra.mrb[6].mxu0 %vm406_vm1, %v600_v30 }
 0x178   : > { %v427_v23 = vpop.xlane.xlu1 %426  ;;  %2546 = vmatmul.mubr.msk.f32.gmra.mrb[14].mxu1 %vm990_vm0, %v1350_v57  ;;  %821 = vmatprep.mubr.f32.mxu0 %v4287_v4  ;;  %v1298_v31 = vmul.f32 0.6931472, %v2843_v0  ;;  %v2845_v36 = vpop.eup %2844 }
 0x179   : > { %2852 = vrsqrt.f32 %v427_v23  ;;  %v1351_v14 = vsub.f32 %v3554_v20, %v1296_v5  ;;  %1657 = vmatprep.mubr.f32.mxu1 %v4287_v4  ;;  %v2847_v1 = vpop.eup %2846  ;;  %v1300_v25 = vmul.f32 0.6931472, %v2845_v36  ;;  %v491_v5 = vsel %vm406_vm1, %v402_v10, 0.0 }
 0x17a   : > { %2854 = vlog2.f32 %v1221_v16  ;;  %v1352_v16 = vsub.f32 %v3537_v54, %v1298_v31  ;;  %v1302_v57 = vmul.f32 0.6931472, %v2847_v1 }
 0x17b   : > { %v1230_v60 = vpop.xlane.xlu0 %1229  ;;  %2511 = vmatmul.mubr.msk.f32.gmra.mrb[8].mxu0 %vm406_vm1, %v601_v63  ;;  %v1353_v3 = vsub.f32 %v3545_v27, %v1300_v25 }
 0x17c   : > { %v430_v2 = vpop.xlane.xlu1 %429  ;;  %2547 = vmatmul.mubr.msk.f32.gmra.mrb[16].mxu1 %vm990_vm0, %v1351_v14  ;;  %827 = vmatprep.mubr.f32.mxu0 %v4287_v4 }
 0x17d   : > { %2856 = vrsqrt.f32 %v430_v2  ;;  %1663 = vmatprep.mubr.f32.mxu1 %v4287_v4 }
 0x17e   : > { %2858 = vlog2.f32 %v1224_v18  ;;  %v3955_v18 = vld [vmem:[%s3390_s23 + $0xf0] sm:$0xff]  ;;  %s2636_s23 = sshll.u32 %s3154_s19, 1  ;;  %s3072_s19 = scalar_lea.vmem %s4208_s14, 32 }
 0x17f   : > { %v2849_v20 = vpop.eup %2848  ;;  %v1233_v21 = vpop.xlane.xlu0 %1232  ;;  %v404_v36 = vmul.f32 %v3955_v18, %v3955_v18  ;;  %s2360_s10 = sadd.s32 %s2637_s24, %s2636_s23  ;;  %p3073_p0 = scmp.ne.s32.totalorder %s4208_s14, %s3072_s19 }
 0x180   : > { %v2851_v26 = vpop.eup %2850  ;;  %v433_v35 = vpop.xlane.xlu1 %432  ;;  %v1276_v37 = vsel %vm990_vm0, %v2849_v20, 0.0  ;;  %2548 = vmatmul.mubr.msk.f32.gmra.mrb[18].mxu1 %vm990_vm0, %v1352_v16  ;;  %s2638_s11 = sshll.u32 %s2360_s10, 4  ;;  %p3080_p5 = scmp.lt.s32.totalorder %s3078_s12, %s3072_s19 }
 0x181   : > { %v540_v30 = vmin.f32 %v2851_v26, 1e+10  ;;  %2860 = vrsqrt.f32 %v433_v35  ;;  %1277 = vadd.xlane.f32.xlu0 %v1276_v37  ;;  %1669 = vmatprep.mubr.f32.mxu1 %v4287_v4  ;;  %v497_v10 = vsel %vm406_vm1, %v404_v36, 0.0  ;;  %s4206_s5 = scalar_lea.hbm %s4263_s4, %s2638_s11  ;;  %p3074_p1 = pnand %p3073_p0, %p3247_p3 }
 0x182   : > { %2862 = vlog2.f32 %v1227_v39  ;;  %p3081_p6 = por %p3080_p5, %p3079_p4 }
 0x183   : > { %v2853_v54 = vpop.eup %2852  ;;  %v602_v0 = vmul.f32 %v540_v30, %v3644_v17  ;;  %v1236_v63 = vpop.xlane.xlu0 %1235  ;;  %v1354_v17 = vsub.f32 %v3558_v38, %v1302_v57  ;;  %p3075_p2 = pneg %p3074_p1 }
 0x184   : > { %v2855_v23 = vpop.eup %2854  ;;  %v541_v14 = vmin.f32 %v2853_v54, 1e+10  ;;  %v436_v31 = vpop.xlane.xlu1 %435  ;;  %2549 = vmatmul.mubr.msk.f32.gmra.mrb[20].mxu1 %vm990_vm0, %v1353_v3 }
 0x185   : > { %2864 = vrsqrt.f32 %v436_v31  ;;  %2512 = vmatmul.mubr.msk.f32.gmra.mrb[10].mxu0 %vm406_vm1, %v602_v0  ;;  %492 = vadd.xlane.f32.xlu0 %v491_v5  ;;  %v1304_v2 = vmul.f32 0.6931472, %v2855_v23  ;;  %p3082_p7 = pnand %p3081_p6, %p3075_p2 }
 0x186   : > { %v603_v39 = vmul.f32 %v541_v14, %v3658_v61  ;;  %2866 = vlog2.f32 %v1230_v60  ;;  %833 = vmatprep.mubr.f32.mxu0 %v4287_v4  ;;  %1675 = vmatprep.mubr.f32.mxu1 %v4287_v4 }
 0x187   : > { %v2857_v27 = vpop.eup %2856  ;;  %v1239_v1 = vpop.xlane.xlu0 %1238  ;;  %v1355_v60 = vsub.f32 %v3573_v13, %v1304_v2 }
 0x188   : > { %v2859_v20 = vpop.eup %2858  ;;  %v542_v16 = vmin.f32 %v2857_v27, 1e+10  ;;  %v439_v25 = vpop.xlane.xlu1 %438  ;;  %2550 = vmatmul.mubr.msk.f32.gmra.mrb[22].mxu1 %vm990_vm0, %v1354_v17 }
 0x189   : > { %2868 = vrsqrt.f32 %v439_v25  ;;  %2513 = vmatmul.mubr.msk.f32.gmra.mrb[12].mxu0 %vm406_vm1, %v603_v39  ;;  %1681 = vmatprep.mubr.f32.mxu1 %v4287_v4  ;;  %v1306_v26 = vmul.f32 0.6931472, %v2859_v20 }
 0x18a   : > { %v604_v61 = vmul.f32 %v542_v16, %v3674_v43  ;;  %2870 = vlog2.f32 %v1233_v21  ;;  %839 = vmatprep.mubr.f32.mxu0 %v4287_v4  ;;  %498 = vadd.xlane.f32.xlu0 %v497_v10 }
 0x18b   : > { %v2861_v38 = vpop.eup %2860  ;;  %v1242_v35 = vpop.xlane.xlu0 %1241  ;;  %v1356_v13 = vsub.f32 %v3580_v52, %v1306_v26 }
 0x18c   : > { %v2863_v37 = vpop.eup %2862  ;;  %v543_v30 = vmin.f32 %v2861_v38, 1e+10  ;;  %v442_v54 = vpop.xlane.xlu1 %441  ;;  %2551 = vmatmul.mubr.msk.f32.gmra.mrb[24].mxu1 %vm990_vm0, %v1355_v60 }
 0x18d   : > { %2872 = vrsqrt.f32 %v442_v54  ;;  %2514 = vmatmul.mubr.msk.f32.gmra.mrb[14].mxu0 %vm406_vm1, %v604_v61  ;;  %1687 = vmatprep.mubr.f32.mxu1 %v4287_v4  ;;  %v1308_v3 = vmul.f32 0.6931472, %v2863_v37 }
 0x18e   : > { %v605_v43 = vmul.f32 %v543_v30, %v3693_v29  ;;  %2874 = vlog2.f32 %v1236_v63  ;;  %845 = vmatprep.mubr.f32.mxu0 %v4287_v4 }
 0x18f   : > { %v2865_v21 = vpop.eup %2864  ;;  %v1245_v57 = vpop.xlane.xlu0 %1244  ;;  %v1357_v52 = vsub.f32 %v3595_v62, %v1308_v3 }
 0x190   : > { %v2867_v0 = vpop.eup %2866  ;;  %v544_v5 = vmin.f32 %v2865_v21, 1e+10  ;;  %v445_v23 = vpop.xlane.xlu1 %444  ;;  %2552 = vmatmul.mubr.msk.f32.gmra.mrb[26].mxu1 %vm990_vm0, %v1356_v13 }
 0x191   : > { %2876 = vrsqrt.f32 %v445_v23  ;;  %2515 = vmatmul.mubr.msk.f32.gmra.mrb[16].mxu0 %vm406_vm1, %v605_v43  ;;  %1693 = vmatprep.mubr.f32.mxu1 %v4287_v4  ;;  %v1310_v14 = vmul.f32 0.6931472, %v2867_v0 }
 0x192   : > { %v606_v29 = vmul.f32 %v544_v5, %v3709_v47  ;;  %2878 = vlog2.f32 %v1239_v1  ;;  %851 = vmatprep.mubr.f32.mxu0 %v4287_v4 }
 0x193   : > { %v2869_v63 = vpop.eup %2868  ;;  %v1248_v31 = vpop.xlane.xlu0 %1247  ;;  %v1358_v62 = vsub.f32 %v3626_v48, %v1310_v14 }
 0x194   : > { %v2871_v36 = vpop.eup %2870  ;;  %v545_v39 = vmin.f32 %v2869_v63, 1e+10  ;;  %v448_v27 = vpop.xlane.xlu1 %447  ;;  %2553 = vmatmul.mubr.msk.f32.gmra.mrb[28].mxu1 %vm990_vm0, %v1357_v52 }
 0x195   : > { %2880 = vrsqrt.f32 %v448_v27  ;;  %2516 = vmatmul.mubr.msk.f32.gmra.mrb[18].mxu0 %vm406_vm1, %v606_v29  ;;  %1699 = vmatprep.mubr.f32.mxu1 %v4287_v4  ;;  %v1312_v2 = vmul.f32 0.6931472, %v2871_v36 }
 0x196   : > { %v607_v47 = vmul.f32 %v545_v39, %v3724_v33  ;;  %2882 = vlog2.f32 %v1242_v35  ;;  %857 = vmatprep.mubr.f32.mxu0 %v4287_v4 }
 0x197   : > { %v2873_v17 = vpop.eup %2872  ;;  %v1251_v1 = vpop.xlane.xlu0 %1250  ;;  %v1359_v48 = vsub.f32 %v3636_v19, %v1312_v2 }
 0x198   : > { %v2875_v20 = vpop.eup %2874  ;;  %v546_v16 = vmin.f32 %v2873_v17, 1e+10  ;;  %v451_v25 = vpop.xlane.xlu1 %450  ;;  %2554 = vmatmul.mubr.msk.f32.gmra.mrb[30].mxu1 %vm990_vm0, %v1358_v62 }
 0x199   : > { %2884 = vrsqrt.f32 %v451_v25  ;;  %2517 = vmatmul.mubr.msk.f32.gmra.mrb[20].mxu0 %vm406_vm1, %v607_v47  ;;  %1705 = vmatprep.mubr.f32.mxu1 %v4287_v4  ;;  %v1314_v61 = vmul.f32 0.6931472, %v2875_v20 }
 0x19a   : > { %v608_v33 = vmul.f32 %v546_v16, %v3735_v7  ;;  %2886 = vlog2.f32 %v1245_v57  ;;  %863 = vmatprep.mubr.f32.mxu0 %v4287_v4 }
 0x19b   : > { %v2877_v10 = vpop.eup %2876  ;;  %v1254_v38 = vpop.xlane.xlu0 %1253  ;;  %v1360_v19 = vsub.f32 %v3650_v11, %v1314_v61 }
 0x19c   : > { %v2879_v60 = vpop.eup %2878  ;;  %v547_v26 = vmin.f32 %v2877_v10, 1e+10  ;;  %v454_v35 = vpop.xlane.xlu1 %453  ;;  %2555 = vmatmul.mubr.msk.f32.gmra.mrb[32].mxu1 %vm990_vm0, %v1359_v48 }
 0x19d   : > { %2888 = vrsqrt.f32 %v454_v35  ;;  %2518 = vmatmul.mubr.msk.f32.gmra.mrb[22].mxu0 %vm406_vm1, %v608_v33  ;;  %1711 = vmatprep.mubr.f32.mxu1 %v4287_v4  ;;  %v1316_v30 = vmul.f32 0.6931472, %v2879_v60 }
 0x19e   : > { %v609_v7 = vmul.f32 %v547_v26, %v3746_v41  ;;  %2890 = vlog2.f32 %v1248_v31  ;;  %869 = vmatprep.mubr.f32.mxu0 %v4287_v4 }
 0x19f   : > { %v2881_v37 = vpop.eup %2880  ;;  %v1257_v54 = vpop.xlane.xlu0 %1256  ;;  %v1361_v11 = vsub.f32 %v3665_v6, %v1316_v30 }
 0x1a0   : > { %v2883_v43 = vpop.eup %2882  ;;  %v548_v21 = vmin.f32 %v2881_v37, 1e+10  ;;  %v457_v13 = vpop.xlane.xlu1 %456  ;;  %2556 = vmatmul.mubr.msk.f32.gmra.mrb[34].mxu1 %vm990_vm0, %v1360_v19 }
 0x1a1   : > { %2892 = vrsqrt.f32 %v457_v13  ;;  %2519 = vmatmul.mubr.msk.f32.gmra.mrb[24].mxu0 %vm406_vm1, %v609_v7  ;;  %1717 = vmatprep.mubr.f32.mxu1 %v4287_v4  ;;  %v1318_v57 = vmul.f32 0.6931472, %v2883_v43 }
 0x1a2   : > { %v610_v41 = vmul.f32 %v548_v21, %v3759_v45  ;;  %2894 = vlog2.f32 %v1251_v1  ;;  %875 = vmatprep.mubr.f32.mxu0 %v4287_v4 }
 0x1a3   : > { %v2885_v3 = vpop.eup %2884  ;;  %v1260_v29 = vpop.xlane.xlu0 %1259  ;;  %v1362_v6 = vsub.f32 %v3682_v8, %v1318_v57 }
 0x1a4   : > { %v2887_v0 = vpop.eup %2886  ;;  %v549_v5 = vmin.f32 %v2885_v3, 1e+10  ;;  %v460_v23 = vpop.xlane.xlu1 %459  ;;  %2557 = vmatmul.mubr.msk.f32.gmra.mrb[36].mxu1 %vm990_vm0, %v1361_v11 }
 0x1a5   : > { %2896 = vrsqrt.f32 %v460_v23  ;;  %2520 = vmatmul.mubr.msk.f32.gmra.mrb[26].mxu0 %vm406_vm1, %v610_v41  ;;  %1723 = vmatprep.mubr.f32.mxu1 %v4287_v4  ;;  %v1320_v52 = vmul.f32 0.6931472, %v2887_v0 }
 0x1a6   : > { %v611_v45 = vmul.f32 %v549_v5, %v3774_v59  ;;  %2898 = vlog2.f32 %v1254_v38  ;;  %881 = vmatprep.mubr.f32.mxu0 %v4287_v4 }
 0x1a7   : > { %v2889_v63 = vpop.eup %2888  ;;  %v1363_v27 = vsub.f32 %v3702_v9, %v1320_v52  ;;  %v1263_v47 = vpop.xlane.xlu0 %1262 }
 0x1a8   : > { %v2891_v14 = vpop.eup %2890  ;;  %v550_v31 = vmin.f32 %v2889_v63, 1e+10  ;;  %v463_v36 = vpop.xlane.xlu1 %462  ;;  %2558 = vmatmul.mubr.msk.f32.gmra.mrb[38].mxu1 %vm990_vm0, %v1362_v6 }
 0x1a9   : > { %2900 = vrsqrt.f32 %v463_v36  ;;  %2521 = vmatmul.mubr.msk.f32.gmra.mrb[28].mxu0 %vm406_vm1, %v611_v45  ;;  %1729 = vmatprep.mubr.f32.mxu1 %v4287_v4  ;;  %v1322_v8 = vmul.f32 0.6931472, %v2891_v14  ;;  %v4300_v14 = vld [vmem:[#allocation6_spill] sm:$0xff]  ;;  %v4301_v36 = vld [vmem:[#allocation7_spill] sm:$0xff] }
 0x1aa   : > { %v612_v39 = vmul.f32 %v550_v31, %v3789_v53  ;;  %2902 = vlog2.f32 %v1257_v54  ;;  %887 = vmatprep.mubr.f32.mxu0 %v4287_v4 }
 0x1ab   : > { %v2893_v59 = vpop.eup %2892  ;;  %v1364_v9 = vsub.f32 %v3713_v24, %v1322_v8  ;;  %v1266_v10 = vpop.xlane.xlu0 %1265  ;;  %v4302_v8 = vld [vmem:[#allocation10_spill] sm:$0xff] }
 0x1ac   : > { %v2895_v17 = vpop.eup %2894  ;;  %v551_v62 = vmin.f32 %v2893_v59, 1e+10  ;;  %v466_v2 = vpop.xlane.xlu1 %465  ;;  %2559 = vmatmul.mubr.msk.f32.gmra.mrb[40].mxu1 %vm990_vm0, %v1363_v27 }
 0x1ad   : > { %2904 = vrsqrt.f32 %v466_v2  ;;  %2522 = vmatmul.mubr.msk.f32.gmra.mrb[30].mxu0 %vm406_vm1, %v612_v39  ;;  %1735 = vmatprep.mubr.f32.mxu1 %v4287_v4  ;;  %v1324_v20 = vmul.f32 0.6931472, %v2895_v17 }
 0x1ae   : > { %v613_v53 = vmul.f32 %v551_v62, %v3803_v50  ;;  %2906 = vlog2.f32 %v1260_v29  ;;  %893 = vmatprep.mubr.f32.mxu0 %v4287_v4  ;;  %v4303_v62 = vld [vmem:[#allocation5_spill] sm:$0xff] }
 0x1af   : > { %v2897_v1 = vpop.eup %2896  ;;  %v1365_v24 = vsub.f32 %v3721_v22, %v1324_v20  ;;  %v1269_v37 = vpop.xlane.xlu0 %1268 }
 0x1b0   : > { %v2899_v16 = vpop.eup %2898  ;;  %v552_v25 = vmin.f32 %v2897_v1, 1e+10  ;;  %v469_v33 = vpop.xlane.xlu1 %468  ;;  %2560 = vmatmul.mubr.msk.f32.gmra.mrb[42].mxu1 %vm990_vm0, %v1364_v9  ;;  %v4304_v9 = vld [vmem:[#allocation11_spill] sm:$0xff] }
 0x1b1   : > { %2908 = vrsqrt.f32 %v469_v33  ;;  %2523 = vmatmul.mubr.msk.f32.gmra.mrb[32].mxu0 %vm406_vm1, %v613_v53  ;;  %1741 = vmatprep.mubr.f32.mxu1 %v4287_v4  ;;  %v1326_v61 = vmul.f32 0.6931472, %v2899_v16 }
 0x1b2   : > { %v614_v50 = vmul.f32 %v552_v25, %v3815_v44  ;;  %2910 = vlog2.f32 %v1263_v47  ;;  %899 = vmatprep.mubr.f32.mxu0 %v4287_v4 }
 0x1b3   : > { %v2901_v48 = vpop.eup %2900  ;;  %v1366_v7 = vsub.f32 %v3739_v32, %v1326_v61 }
 0x1b4   : > { %v2903_v38 = vpop.eup %2902  ;;  %v553_v60 = vmin.f32 %v2901_v48, 1e+10  ;;  %v472_v26 = vpop.xlane.xlu1 %471  ;;  %2561 = vmatmul.mubr.msk.f32.gmra.mrb[44].mxu1 %vm990_vm0, %v1365_v24 }
 0x1b5   : > { %2912 = vrsqrt.f32 %v472_v26  ;;  %2524 = vmatmul.mubr.msk.f32.gmra.mrb[34].mxu0 %vm406_vm1, %v614_v50  ;;  %1747 = vmatprep.mubr.f32.mxu1 %v4287_v4  ;;  %v1328_v22 = vmul.f32 0.6931472, %v2903_v38 }
 0x1b6   : > { %v615_v35 = vmul.f32 %v553_v60, %v3823_v58  ;;  %2914 = vlog2.f32 %v1266_v10  ;;  %905 = vmatprep.mubr.f32.mxu0 %v4287_v4  ;;  %v4305_v10 = vld [vmem:[#allocation12_spill] sm:$0xff]  ;;  %v4306_v60 = vld [vmem:[#allocation13_spill] sm:$0xff] }
 0x1b7   : > { %v2905_v44 = vpop.eup %2904  ;;  %v1367_v32 = vsub.f32 %v3751_v28, %v1328_v22 }
 0x1b8   : > { %v2907_v19 = vpop.eup %2906  ;;  %v554_v30 = vmin.f32 %v2905_v44, 1e+10  ;;  %v475_v54 = vpop.xlane.xlu1 %474  ;;  %2562 = vmatmul.mubr.msk.f32.gmra.mrb[46].mxu1 %vm990_vm0, %v1366_v7 }
 0x1b9   : > { %2916 = vrsqrt.f32 %v475_v54  ;;  %2525 = vmatmul.mubr.msk.f32.gmra.mrb[36].mxu0 %vm406_vm1, %v615_v35  ;;  %1753 = vmatprep.mubr.f32.mxu1 %v4287_v4  ;;  %v1330_v21 = vmul.f32 0.6931472, %v2907_v19 }
 0x1ba   : > { %v616_v58 = vmul.f32 %v554_v30, %v3830_v51  ;;  %2918 = vlog2.f32 %v1269_v37  ;;  %911 = vmatprep.mubr.f32.mxu0 %v4287_v4  ;;  %v4307_v37 = vld [vmem:[#allocation14_spill] sm:$0xff] }
 0x1bb   : > { %v2909_v43 = vpop.eup %2908  ;;  %v1368_v57 = vsub.f32 %v3764_v56, %v1330_v21 }
 0x1bc   : > { %v2911_v13 = vpop.eup %2910  ;;  %v555_v41 = vmin.f32 %v2909_v43, 1e+10  ;;  %v478_v3 = vpop.xlane.xlu1 %477  ;;  %2563 = vmatmul.mubr.msk.f32.gmra.mrb[48].mxu1 %vm990_vm0, %v1367_v32 }
 0x1bd   : > { %2920 = vrsqrt.f32 %v478_v3  ;;  %2526 = vmatmul.mubr.msk.f32.gmra.mrb[38].mxu0 %vm406_vm1, %v616_v58  ;;  %1759 = vmatprep.mubr.f32.mxu1 %v4287_v4  ;;  %v1332_v0 = vmul.f32 0.6931472, %v2911_v13 }
 0x1be   : > { %v617_v11 = vmul.f32 %v555_v41, %v3837_v49  ;;  %917 = vmatprep.mubr.f32.mxu0 %v4287_v4 }
 0x1bf   : > { %v2913_v51 = vpop.eup %2912  ;;  %v1369_v45 = vsub.f32 %v3779_v55, %v1332_v0 }
 0x1c0   : > { %v2915_v28 = vpop.eup %2914  ;;  %v556_v5 = vmin.f32 %v2913_v51, 1e+10  ;;  %v481_v23 = vpop.xlane.xlu1 %480  ;;  %2564 = vmatmul.mubr.msk.f32.gmra.mrb[50].mxu1 %vm990_vm0, %v1368_v57 }
 0x1c1   : > { %2922 = vrsqrt.f32 %v481_v23  ;;  %2527 = vmatmul.mubr.msk.f32.gmra.mrb[40].mxu0 %vm406_vm1, %v617_v11  ;;  %1765 = vmatprep.mubr.f32.mxu1 %v4287_v4  ;;  %v1334_v63 = vmul.f32 0.6931472, %v2915_v28 }
 0x1c2   : > { %v618_v29 = vmul.f32 %v556_v5, %v3844_v12  ;;  %923 = vmatprep.mubr.f32.mxu0 %v4287_v4 }
 0x1c3   : > { %v2917_v49 = vpop.eup %2916  ;;  %v1370_v39 = vsub.f32 %v4301_v36, %v1334_v63 }
 0x1c4   : > { %v2919_v56 = vpop.eup %2918  ;;  %v557_v6 = vmin.f32 %v2917_v49, 1e+10  ;;  %v484_v52 = vpop.xlane.xlu1 %483  ;;  %2565 = vmatmul.mubr.msk.f32.gmra.mrb[52].mxu1 %vm990_vm0, %v1369_v45 }
 0x1c5   : > { %2924 = vrsqrt.f32 %v484_v52  ;;  %2528 = vmatmul.mubr.msk.f32.gmra.mrb[42].mxu0 %vm406_vm1, %v618_v29  ;;  %1771 = vmatprep.mubr.f32.mxu1 %v4287_v4  ;;  %v1336_v59 = vmul.f32 0.6931472, %v2919_v56  ;;  %v4309_v29 = vld [vmem:[#allocation8_spill] sm:$0xff] }
 0x1c6   : > { %v619_v31 = vmul.f32 %v557_v6, %v4300_v14  ;;  %929 = vmatprep.mubr.f32.mxu0 %v4287_v4  ;;  %v1443_v49 = vrot.slane %v4309_v29, 4 }
 0x1c7   : > { %v2921_v12 = vpop.eup %2920  ;;  %v1371_v2 = vsub.f32 %v4303_v62, %v1336_v59 }
 0x1c8   : > { %v558_v55 = vmin.f32 %v2921_v12, 1e+10  ;;  %v487_v27 = vpop.xlane.xlu1 %486  ;;  %2566 = vmatmul.mubr.msk.f32.gmra.mrb[54].mxu1 %vm990_vm0, %v1370_v39  ;;  %v1444_v6 = vadd.f32 %v1443_v49, %v4309_v29 }
 0x1c9   : > { %2926 = vrsqrt.f32 %v487_v27  ;;  %2529 = vmatmul.mubr.msk.f32.gmra.mrb[44].mxu0 %vm406_vm1, %v619_v31  ;;  %1777 = vmatprep.mubr.f32.mxu1 %v4287_v4 }
 0x1ca   : > { %v620_v47 = vmul.f32 %v558_v55, %v4302_v8  ;;  %935 = vmatprep.mubr.f32.mxu0 %v4287_v4  ;;  %v1445_v36 = vrot.slane %v1444_v6, 2  ;;  %v4310_v55 = vld [vmem:[#allocation15_spill] sm:$0xff] }
 0x1cb   : > { %v2923_v17 = vpop.eup %2922 }
 0x1cc   : > { %v559_v53 = vmin.f32 %v2923_v17, 1e+10  ;;  %v490_v1 = vpop.xlane.xlu1 %489  ;;  %2567 = vmatmul.mubr.msk.f32.gmra.mrb[56].mxu1 %vm990_vm0, %v1371_v2 }
 0x1cd   : > { %2928 = vrsqrt.f32 %v490_v1  ;;  %2530 = vmatmul.mubr.msk.f32.gmra.mrb[46].mxu0 %vm406_vm1, %v620_v47  ;;  %1783 = vmatprep.mubr.f32.mxu1 %v4287_v4 }
 0x1ce   : > { %v621_v20 = vmul.f32 %v559_v53, %v4304_v9  ;;  %941 = vmatprep.mubr.f32.mxu0 %v4287_v4 }
 0x1cf   : > { %v2925_v16 = vpop.eup %2924 }
 0x1d0   : > { %v560_v25 = vmin.f32 %v2925_v16, 1e+10  ;;  %v4078_v33 = vpop.f32.mrb[0].mxu0  ;;  %v496_v11 = vpop.xlane.xlu1 %495 }
 0x1d1   : > { %2531 = vmatmul.mubr.msk.f32.gmra.mrb[48].mxu0 %vm406_vm1, %v621_v20  ;;  %v4082_v48 = vpop.f32.mrb[1].mxu0 }
 0x1d2   : > { %v622_v50 = vmul.f32 %v560_v25, %v4305_v10  ;;  %947 = vmatprep.mubr.f32.mxu0 %v4287_v4 }
 0x1d3   : > { %v2927_v24 = vpop.eup %2926 }
 0x1d4   : > { %v561_v61 = vmin.f32 %v2927_v24, 1e+10  ;;  %v4085_v38 = vpop.f32.mrb[2].mxu0  ;;  %v502_v0 = vpop.xlane.xlu1 %501 }
 0x1d5   : > { %2532 = vmatmul.mubr.msk.f32.gmra.mrb[50].mxu0 %vm406_vm1, %v622_v50  ;;  %v4089_v35 = vpop.f32.mrb[3].mxu0 }
 0x1d6   : > { %v623_v26 = vmul.f32 %v561_v61, %v4306_v60  ;;  %953 = vmatprep.mubr.f32.mxu0 %v4287_v4 }
 0x1d7   : > { %v2929_v44 = vpop.eup %2928 }
 0x1d8   : > { %v562_v7 = vmin.f32 %v2929_v44, 1e+10  ;;  %v4092_v22 = vpop.f32.mrb[4].mxu0 }
 0x1d9   : > { %2533 = vmatmul.mubr.msk.f32.gmra.mrb[52].mxu0 %vm406_vm1, %v623_v26  ;;  %v4096_v30 = vpop.f32.mrb[5].mxu0 }
 0x1da   : > { %v624_v19 = vmul.f32 %v562_v7, %v4307_v37  ;;  %959 = vmatprep.mubr.f32.mxu0 %v4287_v4 }
 0x1dd   : > { %2534 = vmatmul.mubr.msk.f32.gmra.mrb[54].mxu0 %vm406_vm1, %v624_v19 }
 0x1de   : > { %965 = vmatprep.mubr.f32.mxu0 %v4287_v4 }
 0x1fd   : > { %v1272_v54 = vpop.xlane.xlu0 %1271 }
 0x1fe   : > { %2930 = vlog2.f32 %v1272_v54 }
 0x201   : > { %v1275_v58 = vpop.xlane.xlu0 %1274 }
 0x202   : > { %2932 = vlog2.f32 %v1275_v58 }
 0x208   : > { %v2931_v43 = vpop.eup %2930 }
 0x209   : > { %v1338_v32 = vmul.f32 0.6931472, %v2931_v43 }
 0x20b   : > { %v1372_v21 = vsub.f32 %v3909_v34, %v1338_v32  ;;  %v4308_v34 = vld [vmem:[#allocation9_spill] sm:$0xff] }
 0x20c   : > { %v2933_v13 = vpop.eup %2932  ;;  %v1436_v28 = vrot.slane %v4308_v34, 4 }
 0x20d   : > { %v1340_v41 = vmul.f32 0.6931472, %v2933_v13  ;;  %2568 = vmatmul.mubr.msk.f32.gmra.mrb[58].mxu1 %vm990_vm0, %v1372_v21 }
 0x20e   : > { %v1278_v3 = vpop.xlane.xlu0 %1277  ;;  %1789 = vmatprep.mubr.f32.mxu1 %v4287_v4 }
 0x20f   : > { %2934 = vlog2.f32 %v1278_v3  ;;  %v1373_v51 = vsub.f32 %v3901_v15, %v1340_v41  ;;  %v1437_v15 = vadd.f32 %v1436_v28, %v4308_v34 }
 0x210   : > { %2936 = vrsqrt.f32 %v496_v11 }
 0x211   : > { %2569 = vmatmul.mubr.msk.f32.gmra.mrb[60].mxu1 %vm990_vm0, %v1373_v51  ;;  %v1438_v12 = vrot.slane %v1437_v15, 2 }
 0x212   : > { %v493_v57 = vpop.xlane.xlu0 %492  ;;  %1795 = vmatprep.mubr.f32.mxu1 %v4287_v4 }
 0x213   : > { %2938 = vrsqrt.f32 %v493_v57  ;;  %v1439_v47 = vadd.f32 %v1438_v12, %v1437_v15 }
 0x215   : > { %v1440_v53 = vrot.slane %v1439_v47, 1 }
 0x217   : > { %v499_v5 = vpop.xlane.xlu0 %498  ;;  %v4121_v9 = vadd.f32 %v1440_v53, %v1439_v47 }
 0x218   : > { %2940 = vrsqrt.f32 %v499_v5 }
 0x219   : > { %v2935_v23 = vpop.eup %2934  ;;  %2942 = vrsqrt.f32 %v502_v0 }
 0x21a   : > { %v1342_v45 = vmul.f32 0.6931472, %v2935_v23  ;;  %v2937_v63 = vpop.eup %2936 }
 0x21b   : > { %v564_v31 = vmin.f32 %v2937_v63, 1e+10 }
 0x21c   : > { %v1374_v56 = vsub.f32 %v3926_v46, %v1342_v45  ;;  %v1446_v46 = vadd.f32 %v1445_v36, %v1444_v6 }
 0x21d   : > { %v2939_v52 = vpop.eup %2938  ;;  %v626_v27 = vmul.f32 %v564_v31, %v4310_v55 }
 0x21e   : > { %2570 = vmatmul.mubr.msk.f32.gmra.mrb[62].mxu1 %vm990_vm0, %v1374_v56  ;;  %v563_v14 = vmin.f32 %v2939_v52, 1e+10 }
 0x220   : > { %v625_v39 = vmul.f32 %v563_v14, %v3944_v42  ;;  %v1447_v42 = vrot.slane %v1446_v46, 1 }
 0x222   : > { %v2941_v59 = vpop.eup %2940  ;;  %2535 = vmatmul.mubr.msk.f32.gmra.mrb[56].mxu0 %vm406_vm1, %v625_v39  ;;  %v4124_v20 = vadd.f32 %v1447_v42, %v1446_v46 }
 0x223   : > { %v2943_v8 = vpop.eup %2942  ;;  %v565_v17 = vmin.f32 %v2941_v59, 1e+10  ;;  %971 = vmatprep.mubr.f32.mxu0 %v4287_v4 }
 0x224   : > { %v566_v2 = vmin.f32 %v2943_v8, 1e+10 }
 0x225   : > { %v627_v62 = vmul.f32 %v565_v17, %v3955_v18 }
 0x226   : > { %2536 = vmatmul.mubr.msk.f32.gmra.mrb[58].mxu0 %vm406_vm1, %v626_v27  ;;  %v628_v1 = vmul.f32 %v566_v2, %v3893_v40 }
 0x227   : > { %977 = vmatprep.mubr.f32.mxu0 %v4287_v4 }
 0x22a   : > { %2537 = vmatmul.mubr.msk.f32.gmra.mrb[60].mxu0 %vm406_vm1, %v627_v62 }
 0x22b   : > { %983 = vmatprep.mubr.f32.mxu0 %v4287_v4 }
 0x22e   : > { %v1611_v16 = vpop.f32.mrb[0].mxu1  ;;  %2538 = vmatmul.mubr.msk.f32.gmra.mrb[62].mxu0 %vm406_vm1, %v628_v1 }
 0x22f   : > { %v1802_v18 = vsub.f32 %v4121_v9, %v1611_v16  ;;  %v1613_v25 = vpop.f32.mrb[1].mxu1 }
 0x230   : > { %v1803_v10 = vsub.f32 %v4124_v20, %v1613_v25 }
 0x231   : > { %v2571_v50 = vadd.f32 -1.1, %v1802_v18 }
 0x232   : > { %v2572_v24 = vadd.f32 -1.1, %v1803_v10  ;;  %v1617_v61 = vpop.f32.mrb[2].mxu1 }
 0x233   : > { %v1930_v40 = vmul.f32 0.5, %v2571_v50  ;;  %v1804_v60 = vsub.f32 %v4121_v9, %v1617_v61  ;;  %v1619_v26 = vpop.f32.mrb[3].mxu1 }
 0x234   : > { %v1931_v44 = vmul.f32 0.5, %v2572_v24  ;;  %v1805_v4 = vsub.f32 %v4124_v20, %v1619_v26 }
 0x235   : > { %2944 = vtanh.f32 %v1930_v40  ;;  %v2573_v7 = vadd.f32 -1.1, %v1804_v60 }
 0x236   : > { %2946 = vtanh.f32 %v1931_v44  ;;  %v2574_v37 = vadd.f32 -1.1, %v1805_v4  ;;  %v1623_v19 = vpop.f32.mrb[4].mxu1 }
 0x237   : > { %v1932_v54 = vmul.f32 0.5, %v2573_v7  ;;  %v1806_v58 = vsub.f32 %v4121_v9, %v1623_v19  ;;  %v1625_v43 = vpop.f32.mrb[5].mxu1 }
 0x238   : > { %v1933_v32 = vmul.f32 0.5, %v2574_v37  ;;  %v1807_v21 = vsub.f32 %v4124_v20, %v1625_v43 }
 0x239   : > { %2948 = vtanh.f32 %v1932_v54  ;;  %v2575_v13 = vadd.f32 -1.1, %v1806_v58 }
 0x23a   : > { %2950 = vtanh.f32 %v1933_v32  ;;  %v2576_v41 = vadd.f32 -1.1, %v1807_v21  ;;  %v1629_v3 = vpop.f32.mrb[6].mxu1 }
 0x23b   : > { %v1934_v11 = vmul.f32 0.5, %v2575_v13  ;;  %v1808_v51 = vsub.f32 %v4121_v9, %v1629_v3  ;;  %v1631_v57 = vpop.f32.mrb[7].mxu1 }
 0x23c   : > { %v1935_v0 = vmul.f32 0.5, %v2576_v41  ;;  %v1809_v34 = vsub.f32 %v4124_v20, %v1631_v57 }
 0x23d   : > { %2952 = vtanh.f32 %v1934_v11  ;;  %v2577_v28 = vadd.f32 -1.1, %v1808_v51 }
 0x23e   : > { %2954 = vtanh.f32 %v1935_v0  ;;  %v2578_v5 = vadd.f32 -1.1, %v1809_v34  ;;  %v1635_v23 = vpop.f32.mrb[8].mxu1 }
 0x23f   : > { %v2945_v29 = vpop.eup %2944  ;;  %v1936_v49 = vmul.f32 0.5, %v2577_v28  ;;  %v1810_v45 = vsub.f32 %v4121_v9, %v1635_v23  ;;  %v1637_v63 = vpop.f32.mrb[9].mxu1 }
 0x240   : > { %v2947_v15 = vpop.eup %2946  ;;  %v2058_v56 = vsub.f32 0.0, %v2945_v29  ;;  %v1937_v6 = vmul.f32 0.5, %v2578_v5  ;;  %v1811_v52 = vsub.f32 %v4124_v20, %v1637_v63 }
 0x241   : > { %v2059_v14 = vsub.f32 0.0, %v2947_v15  ;;  %2956 = vtanh.f32 %v1936_v49  ;;  %v2579_v31 = vadd.f32 -1.1, %v1810_v45 }
 0x242   : > { %v2122_v12 = vsub.f32 %v4078_v33, %v2058_v56  ;;  %2958 = vtanh.f32 %v1937_v6  ;;  %v2580_v36 = vadd.f32 -1.1, %v1811_v52  ;;  %v1641_v39 = vpop.f32.mrb[10].mxu1 }
 0x243   : > { %v2949_v59 = vpop.eup %2948  ;;  %v2123_v55 = vsub.f32 %v4082_v48, %v2059_v14  ;;  %v1938_v27 = vmul.f32 0.5, %v2579_v31  ;;  %v1812_v8 = vsub.f32 %v4121_v9, %v1641_v39  ;;  %v1643_v47 = vpop.f32.mrb[11].mxu1 }
 0x244   : > { %v2951_v17 = vpop.eup %2950  ;;  %v2060_v46 = vsub.f32 0.0, %v2949_v59  ;;  %v1939_v62 = vmul.f32 0.5, %v2580_v36  ;;  %v1813_v2 = vsub.f32 %v4124_v20, %v1643_v47  ;;  %v2186_v18 = vmul.f32 %v2122_v12, %v2122_v12 }
 0x245   : > { %v2061_v53 = vsub.f32 0.0, %v2951_v17  ;;  %2960 = vtanh.f32 %v1938_v27  ;;  %v2581_v42 = vadd.f32 -1.1, %v1812_v8  ;;  %v2187_v25 = vmul.f32 %v2123_v55, %v2123_v55 }
 0x246   : > { %v2124_v33 = vsub.f32 %v4085_v38, %v2060_v46  ;;  %2962 = vtanh.f32 %v1939_v62  ;;  %v2582_v1 = vadd.f32 -1.1, %v1813_v2 }
 0x247   : > { %v2953_v16 = vpop.eup %2952  ;;  %v2125_v48 = vsub.f32 %v4089_v35, %v2061_v53  ;;  %v1940_v10 = vmul.f32 0.5, %v2581_v42  ;;  %v1647_v50 = vpop.f32.mrb[12].mxu1 }
 0x248   : > { %v2955_v24 = vpop.eup %2954  ;;  %v2188_v61 = vmul.f32 %v2124_v33, %v2124_v33  ;;  %v1941_v40 = vmul.f32 0.5, %v2582_v1  ;;  %v2062_v60 = vsub.f32 0.0, %v2953_v16  ;;  %v1814_v26 = vsub.f32 %v4121_v9, %v1647_v50  ;;  %v1649_v44 = vpop.f32.mrb[13].mxu1 }
 0x249   : > { %v2189_v4 = vmul.f32 %v2125_v48, %v2125_v48  ;;  %2964 = vtanh.f32 %v1940_v10  ;;  %v2063_v7 = vsub.f32 0.0, %v2955_v24  ;;  %v1815_v38 = vsub.f32 %v4124_v20, %v1649_v44 }
 0x24a   : > { %2966 = vtanh.f32 %v1941_v40  ;;  %v2126_v37 = vsub.f32 %v4092_v22, %v2062_v60  ;;  %v2250_v19 = vadd.f32 %v2188_v61, %v2186_v18  ;;  %v2583_v54 = vadd.f32 -1.1, %v1814_v26  ;;  %v817_v35 = vpop.f32.mrb[6].mxu0 }
 0x24b   : > { %v2957_v58 = vpop.eup %2956  ;;  %v2127_v43 = vsub.f32 %v4096_v30, %v2063_v7  ;;  %v2287_v32 = vadd.f32 %v2189_v4, %v2187_v25  ;;  %v2584_v21 = vadd.f32 -1.1, %v1815_v38  ;;  %v1653_v13 = vpop.f32.mrb[14].mxu1 }
 0x24c   : > { %v819_v41 = vpop.f32.mrb[7].mxu0  ;;  %v2959_v3 = vpop.eup %2958  ;;  %v2190_v11 = vmul.f32 %v2126_v37, %v2126_v37  ;;  %v1942_v51 = vmul.f32 0.5, %v2583_v54  ;;  %v2064_v57 = vsub.f32 0.0, %v2957_v58  ;;  %v1816_v0 = vsub.f32 %v4121_v9, %v1653_v13 }
 0x24d   : > { %v1655_v34 = vpop.f32.mrb[15].mxu1  ;;  %v2191_v28 = vmul.f32 %v2127_v43, %v2127_v43  ;;  %v1943_v5 = vmul.f32 0.5, %v2584_v21  ;;  %v2065_v22 = vsub.f32 0.0, %v2959_v3 }
 0x24e   : > { %v1817_v23 = vsub.f32 %v4124_v20, %v1655_v34  ;;  %v2251_v29 = vadd.f32 %v2250_v19, %v2190_v11  ;;  %2968 = vtanh.f32 %v1942_v51  ;;  %v2128_v49 = vsub.f32 %v817_v35, %v2064_v57  ;;  %v823_v45 = vpop.f32.mrb[8].mxu0 }
 0x24f   : > { %v2585_v30 = vadd.f32 -1.1, %v1816_v0  ;;  %v2961_v63 = vpop.eup %2960  ;;  %v2288_v15 = vadd.f32 %v2287_v32, %v2191_v28  ;;  %2970 = vtanh.f32 %v1943_v5  ;;  %v2129_v56 = vsub.f32 %v819_v41, %v2065_v22  ;;  %v1659_v52 = vpop.f32.mrb[16].mxu1 }
 0x250   : > { %v2586_v6 = vadd.f32 -1.1, %v1817_v23  ;;  %v825_v14 = vpop.f32.mrb[9].mxu0  ;;  %v2963_v31 = vpop.eup %2962  ;;  %v2192_v12 = vmul.f32 %v2128_v49, %v2128_v49  ;;  %v1818_v39 = vsub.f32 %v4121_v9, %v1659_v52  ;;  %v2066_v55 = vsub.f32 0.0, %v2961_v63 }
 0x251   : > { %v1944_v36 = vmul.f32 0.5, %v2585_v30  ;;  %v1661_v59 = vpop.f32.mrb[17].mxu1  ;;  %v2193_v27 = vmul.f32 %v2129_v56, %v2129_v56  ;;  %v2067_v17 = vsub.f32 0.0, %v2963_v31 }
 0x252   : > { %v1945_v8 = vmul.f32 0.5, %v2586_v6  ;;  %v1819_v47 = vsub.f32 %v4124_v20, %v1661_v59  ;;  %v2252_v46 = vadd.f32 %v2251_v29, %v2192_v12  ;;  %v2587_v62 = vadd.f32 -1.1, %v1818_v39 }
 0x253   : > { %2972 = vtanh.f32 %v1944_v36  ;;  %v2130_v2 = vsub.f32 %v823_v45, %v2066_v55  ;;  %v2965_v53 = vpop.eup %2964  ;;  %v2289_v42 = vadd.f32 %v2288_v15, %v2193_v27  ;;  %v2131_v1 = vsub.f32 %v825_v14, %v2067_v17  ;;  %v1665_v16 = vpop.f32.mrb[18].mxu1 }
 0x254   : > { %2974 = vtanh.f32 %v1945_v8  ;;  %v2588_v33 = vadd.f32 -1.1, %v1819_v47  ;;  %v2967_v18 = vpop.eup %2966  ;;  %v1946_v25 = vmul.f32 0.5, %v2587_v62  ;;  %v1820_v10 = vsub.f32 %v4121_v9, %v1665_v16  ;;  %v1667_v50 = vpop.f32.mrb[19].mxu1 }
 0x255   : > { %v2194_v48 = vmul.f32 %v2130_v2, %v2130_v2  ;;  %v2068_v24 = vsub.f32 0.0, %v2965_v53  ;;  %v2195_v40 = vmul.f32 %v2131_v1, %v2131_v1  ;;  %v1821_v60 = vsub.f32 %v4124_v20, %v1667_v50 }
 0x256   : > { %v1947_v61 = vmul.f32 0.5, %v2588_v33  ;;  %v2069_v26 = vsub.f32 0.0, %v2967_v18  ;;  %2976 = vtanh.f32 %v1946_v25  ;;  %v2589_v4 = vadd.f32 -1.1, %v1820_v10 }
 0x257   : > { %v2253_v44 = vadd.f32 %v2252_v46, %v2194_v48  ;;  %v2290_v7 = vadd.f32 %v2289_v42, %v2195_v40  ;;  %v2590_v38 = vadd.f32 -1.1, %v1821_v60  ;;  %v1671_v19 = vpop.f32.mrb[20].mxu1 }
 0x258   : > { %2978 = vtanh.f32 %v1947_v61  ;;  %v829_v37 = vpop.f32.mrb[10].mxu0  ;;  %v2969_v54 = vpop.eup %2968  ;;  %v1948_v35 = vmul.f32 0.5, %v2589_v4  ;;  %v1822_v43 = vsub.f32 %v4121_v9, %v1671_v19 }
 0x259   : > { %v2132_v58 = vsub.f32 %v829_v37, %v2068_v24  ;;  %v831_v32 = vpop.f32.mrb[11].mxu0  ;;  %v1673_v21 = vpop.f32.mrb[21].mxu1  ;;  %v1949_v41 = vmul.f32 0.5, %v2590_v38  ;;  %v2070_v51 = vsub.f32 0.0, %v2969_v54 }
 0x25a   : > { %v2971_v13 = vpop.eup %2970  ;;  %v2133_v3 = vsub.f32 %v831_v32, %v2069_v26  ;;  %v1823_v11 = vsub.f32 %v4124_v20, %v1673_v21  ;;  %2980 = vtanh.f32 %v1948_v35  ;;  %v2591_v0 = vadd.f32 -1.1, %v1822_v43 }
 0x25b   : > { %v2196_v57 = vmul.f32 %v2132_v58, %v2132_v58  ;;  %v2071_v34 = vsub.f32 0.0, %v2971_v13  ;;  %2982 = vtanh.f32 %v1949_v41  ;;  %v1677_v23 = vpop.f32.mrb[22].mxu1 }
 0x25c   : > { %v2197_v28 = vmul.f32 %v2133_v3, %v2133_v3  ;;  %v2592_v5 = vadd.f32 -1.1, %v1823_v11  ;;  %v835_v22 = vpop.f32.mrb[12].mxu0  ;;  %v1950_v30 = vmul.f32 0.5, %v2591_v0  ;;  %v1824_v63 = vsub.f32 %v4121_v9, %v1677_v23  ;;  %v1679_v56 = vpop.f32.mrb[23].mxu1 }
 0x25d   : > { %v2973_v29 = vpop.eup %2972  ;;  %v2254_v49 = vadd.f32 %v2253_v44, %v2196_v57  ;;  %v2134_v45 = vsub.f32 %v835_v22, %v2070_v51  ;;  %v837_v15 = vpop.f32.mrb[13].mxu0  ;;  %v1825_v12 = vsub.f32 %v4124_v20, %v1679_v56 }
 0x25e   : > { %v2975_v6 = vpop.eup %2974  ;;  %v2291_v52 = vadd.f32 %v2290_v7, %v2197_v28  ;;  %v1951_v14 = vmul.f32 0.5, %v2592_v5  ;;  %v2135_v31 = vsub.f32 %v837_v15, %v2071_v34  ;;  %2984 = vtanh.f32 %v1950_v30 }
 0x25f   : > { %v2198_v36 = vmul.f32 %v2134_v45, %v2134_v45  ;;  %v2593_v39 = vadd.f32 -1.1, %v1824_v63  ;;  %v2072_v59 = vsub.f32 0.0, %v2973_v29  ;;  %v2594_v27 = vadd.f32 -1.1, %v1825_v12  ;;  %v1683_v47 = vpop.f32.mrb[24].mxu1 }
 0x260   : > { %2986 = vtanh.f32 %v1951_v14  ;;  %v2199_v55 = vmul.f32 %v2135_v31, %v2135_v31  ;;  %v841_v8 = vpop.f32.mrb[14].mxu0  ;;  %v2073_v17 = vsub.f32 0.0, %v2975_v6  ;;  %v2977_v46 = vpop.eup %2976  ;;  %v1826_v42 = vsub.f32 %v4121_v9, %v1683_v47 }
 0x261   : > { %v2255_v62 = vadd.f32 %v2254_v49, %v2198_v36  ;;  %v1952_v2 = vmul.f32 0.5, %v2593_v39  ;;  %v2136_v53 = vsub.f32 %v841_v8, %v2072_v59  ;;  %v843_v33 = vpop.f32.mrb[15].mxu0  ;;  %v1685_v1 = vpop.f32.mrb[25].mxu1  ;;  %v1953_v25 = vmul.f32 0.5, %v2594_v27 }
 0x262   : > { %v2979_v16 = vpop.eup %2978  ;;  %v2292_v18 = vadd.f32 %v2291_v52, %v2199_v55  ;;  %v2137_v48 = vsub.f32 %v843_v33, %v2073_v17  ;;  %v1827_v10 = vsub.f32 %v4124_v20, %v1685_v1  ;;  %v2595_v24 = vadd.f32 -1.1, %v1826_v42 }
 0x263   : > { %2988 = vtanh.f32 %v1952_v2  ;;  %v2200_v50 = vmul.f32 %v2136_v53, %v2136_v53  ;;  %v2074_v61 = vsub.f32 0.0, %v2977_v46  ;;  %v1689_v44 = vpop.f32.mrb[26].mxu1  ;;  %v2075_v4 = vsub.f32 0.0, %v2979_v16 }
 0x264   : > { %2990 = vtanh.f32 %v1953_v25  ;;  %v2201_v40 = vmul.f32 %v2137_v48, %v2137_v48  ;;  %v2596_v60 = vadd.f32 -1.1, %v1827_v10  ;;  %v847_v26 = vpop.f32.mrb[16].mxu0  ;;  %v2981_v7 = vpop.eup %2980  ;;  %v1954_v37 = vmul.f32 0.5, %v2595_v24 }
 0x265   : > { %v2256_v38 = vadd.f32 %v2255_v62, %v2200_v50  ;;  %v2138_v19 = vsub.f32 %v847_v26, %v2074_v61  ;;  %v1828_v54 = vsub.f32 %v4121_v9, %v1689_v44  ;;  %v849_v35 = vpop.f32.mrb[17].mxu0  ;;  %v1691_v58 = vpop.f32.mrb[27].mxu1  ;;  %v2076_v51 = vsub.f32 0.0, %v2981_v7 }
 0x266   : > { %v2983_v43 = vpop.eup %2982  ;;  %v2293_v32 = vadd.f32 %v2292_v18, %v2201_v40  ;;  %v1955_v21 = vmul.f32 0.5, %v2596_v60  ;;  %v2139_v13 = vsub.f32 %v849_v35, %v2075_v4  ;;  %v1829_v41 = vsub.f32 %v4124_v20, %v1691_v58 }
 0x267   : > { %2992 = vtanh.f32 %v1954_v37  ;;  %v2202_v3 = vmul.f32 %v2138_v19, %v2138_v19  ;;  %v2597_v11 = vadd.f32 -1.1, %v1828_v54  ;;  %v1695_v28 = vpop.f32.mrb[28].mxu1  ;;  %v2077_v5 = vsub.f32 0.0, %v2983_v43 }
 0x268   : > { %2994 = vtanh.f32 %v1955_v21  ;;  %v2203_v57 = vmul.f32 %v2139_v13, %v2139_v13  ;;  %v2598_v0 = vadd.f32 -1.1, %v1829_v41  ;;  %v853_v34 = vpop.f32.mrb[18].mxu0  ;;  %v2985_v22 = vpop.eup %2984  ;;  %v1830_v30 = vsub.f32 %v4121_v9, %v1695_v28 }
 0x269   : > { %v2257_v23 = vadd.f32 %v2256_v38, %v2202_v3  ;;  %v1956_v29 = vmul.f32 0.5, %v2597_v11  ;;  %v2140_v49 = vsub.f32 %v853_v34, %v2076_v51  ;;  %v855_v45 = vpop.f32.mrb[19].mxu0  ;;  %v1697_v63 = vpop.f32.mrb[29].mxu1  ;;  %v2078_v36 = vsub.f32 0.0, %v2985_v22 }
 0x26a   : > { %v2987_v15 = vpop.eup %2986  ;;  %v2294_v56 = vadd.f32 %v2293_v32, %v2203_v57  ;;  %v1957_v6 = vmul.f32 0.5, %v2598_v0  ;;  %v2141_v52 = vsub.f32 %v855_v45, %v2077_v5  ;;  %v1831_v14 = vsub.f32 %v4124_v20, %v1697_v63 }
 0x26b   : > { %2996 = vtanh.f32 %v1956_v29  ;;  %v2204_v31 = vmul.f32 %v2140_v49, %v2140_v49  ;;  %v2599_v12 = vadd.f32 -1.1, %v1830_v30  ;;  %v1701_v27 = vpop.f32.mrb[30].mxu1  ;;  %v2079_v8 = vsub.f32 0.0, %v2987_v15 }
 0x26c   : > { %2998 = vtanh.f32 %v1957_v6  ;;  %v2205_v39 = vmul.f32 %v2141_v52, %v2141_v52  ;;  %v2600_v59 = vadd.f32 -1.1, %v1831_v14  ;;  %v859_v55 = vpop.f32.mrb[20].mxu0  ;;  %v1832_v2 = vsub.f32 %v4121_v9, %v1701_v27  ;;  %v1703_v42 = vpop.f32.mrb[31].mxu1 }
 0x26d   : > { %v2989_v47 = vpop.eup %2988  ;;  %v2258_v17 = vadd.f32 %v2257_v23, %v2204_v31  ;;  %v1958_v46 = vmul.f32 0.5, %v2599_v12  ;;  %v2142_v62 = vsub.f32 %v859_v55, %v2078_v36  ;;  %v861_v53 = vpop.f32.mrb[21].mxu0  ;;  %v1833_v25 = vsub.f32 %v4124_v20, %v1703_v42 }
 0x26e   : > { %v2991_v33 = vpop.eup %2990  ;;  %v2295_v1 = vadd.f32 %v2294_v56, %v2205_v39  ;;  %v1959_v16 = vmul.f32 0.5, %v2600_v59  ;;  %v2143_v18 = vsub.f32 %v861_v53, %v2079_v8  ;;  %v2601_v10 = vadd.f32 -1.1, %v1832_v2 }
 0x26f   : > { %3000 = vtanh.f32 %v1958_v46  ;;  %v2206_v48 = vmul.f32 %v2142_v62, %v2142_v62  ;;  %v2080_v50 = vsub.f32 0.0, %v2989_v47  ;;  %v2602_v61 = vadd.f32 -1.1, %v1833_v25  ;;  %v1707_v60 = vpop.f32.mrb[32].mxu1 }
 0x270   : > { %3002 = vtanh.f32 %v1959_v16  ;;  %v2207_v24 = vmul.f32 %v2143_v18, %v2143_v18  ;;  %v865_v40 = vpop.f32.mrb[22].mxu0  ;;  %v2081_v26 = vsub.f32 0.0, %v2991_v33  ;;  %v1960_v7 = vmul.f32 0.5, %v2601_v10  ;;  %v1709_v54 = vpop.f32.mrb[33].mxu1 }
 0x271   : > { %v2993_v44 = vpop.eup %2992  ;;  %v2259_v4 = vadd.f32 %v2258_v17, %v2206_v48  ;;  %v2144_v38 = vsub.f32 %v865_v40, %v2080_v50  ;;  %v1834_v37 = vsub.f32 %v4121_v9, %v1707_v60  ;;  %v867_v19 = vpop.f32.mrb[23].mxu0  ;;  %v1961_v43 = vmul.f32 0.5, %v2602_v61 }
 0x272   : > { %v2995_v35 = vpop.eup %2994  ;;  %v2296_v58 = vadd.f32 %v2295_v1, %v2207_v24  ;;  %v2145_v32 = vsub.f32 %v867_v19, %v2081_v26  ;;  %v1835_v21 = vsub.f32 %v4124_v20, %v1709_v54  ;;  %3004 = vtanh.f32 %v1960_v7 }
 0x273   : > { %v2208_v13 = vmul.f32 %v2144_v38, %v2144_v38  ;;  %v2603_v41 = vadd.f32 -1.1, %v1834_v37  ;;  %v2082_v3 = vsub.f32 0.0, %v2993_v44  ;;  %3006 = vtanh.f32 %v1961_v43  ;;  %v1713_v0 = vpop.f32.mrb[34].mxu1 }
 0x274   : > { %v2209_v11 = vmul.f32 %v2145_v32, %v2145_v32  ;;  %v2604_v51 = vadd.f32 -1.1, %v1835_v21  ;;  %v871_v57 = vpop.f32.mrb[24].mxu0  ;;  %v2083_v34 = vsub.f32 0.0, %v2995_v35  ;;  %v1836_v29 = vsub.f32 %v4121_v9, %v1713_v0  ;;  %v1715_v30 = vpop.f32.mrb[35].mxu1 }
 0x275   : > { %v2997_v28 = vpop.eup %2996  ;;  %v2260_v5 = vadd.f32 %v2259_v4, %v2208_v13  ;;  %v1962_v22 = vmul.f32 0.5, %v2603_v41  ;;  %v2146_v23 = vsub.f32 %v871_v57, %v2082_v3  ;;  %v873_v49 = vpop.f32.mrb[25].mxu0  ;;  %v1837_v6 = vsub.f32 %v4124_v20, %v1715_v30 }
 0x276   : > { %v2999_v45 = vpop.eup %2998  ;;  %v2297_v63 = vadd.f32 %v2296_v58, %v2209_v11  ;;  %v1963_v15 = vmul.f32 0.5, %v2604_v51  ;;  %v2147_v56 = vsub.f32 %v873_v49, %v2083_v34  ;;  %v2605_v14 = vadd.f32 -1.1, %v1836_v29 }
 0x277   : > { %3008 = vtanh.f32 %v1962_v22  ;;  %v2210_v52 = vmul.f32 %v2146_v23, %v2146_v23  ;;  %v2084_v31 = vsub.f32 0.0, %v2997_v28  ;;  %v2606_v36 = vadd.f32 -1.1, %v1837_v6  ;;  %v1719_v59 = vpop.f32.mrb[36].mxu1 }
 0x278   : > { %3010 = vtanh.f32 %v1963_v15  ;;  %v2211_v12 = vmul.f32 %v2147_v56, %v2147_v56  ;;  %v877_v39 = vpop.f32.mrb[26].mxu0  ;;  %v2085_v55 = vsub.f32 0.0, %v2999_v45  ;;  %v1964_v47 = vmul.f32 0.5, %v2605_v14  ;;  %v1721_v2 = vpop.f32.mrb[37].mxu1 }
 0x279   : > { %v3001_v27 = vpop.eup %3000  ;;  %v2261_v8 = vadd.f32 %v2260_v5, %v2210_v52  ;;  %v2148_v17 = vsub.f32 %v877_v39, %v2084_v31  ;;  %v1838_v46 = vsub.f32 %v4121_v9, %v1719_v59  ;;  %v879_v62 = vpop.f32.mrb[27].mxu0  ;;  %v1965_v33 = vmul.f32 0.5, %v2606_v36 }
 0x27a   : > { %v3003_v53 = vpop.eup %3002  ;;  %v2298_v42 = vadd.f32 %v2297_v63, %v2211_v12  ;;  %v2149_v1 = vsub.f32 %v879_v62, %v2085_v55  ;;  %v1839_v16 = vsub.f32 %v4124_v20, %v1721_v2  ;;  %3012 = vtanh.f32 %v1964_v47 }
 0x27b   : > { %v2212_v18 = vmul.f32 %v2148_v17, %v2148_v17  ;;  %v2607_v25 = vadd.f32 -1.1, %v1838_v46  ;;  %v2086_v48 = vsub.f32 0.0, %v3001_v27  ;;  %3014 = vtanh.f32 %v1965_v33  ;;  %v1725_v61 = vpop.f32.mrb[38].mxu1 }
 0x27c   : > { %v2213_v10 = vmul.f32 %v2149_v1, %v2149_v1  ;;  %v2608_v50 = vadd.f32 -1.1, %v1839_v16  ;;  %v883_v24 = vpop.f32.mrb[28].mxu0  ;;  %v2087_v40 = vsub.f32 0.0, %v3003_v53  ;;  %v3005_v60 = vpop.eup %3004  ;;  %v1840_v7 = vsub.f32 %v4121_v9, %v1725_v61 }
 0x27d   : > { %v2262_v26 = vadd.f32 %v2261_v8, %v2212_v18  ;;  %v1966_v44 = vmul.f32 0.5, %v2607_v25  ;;  %v2150_v4 = vsub.f32 %v883_v24, %v2086_v48  ;;  %v885_v38 = vpop.f32.mrb[29].mxu0  ;;  %v1727_v37 = vpop.f32.mrb[39].mxu1  ;;  %v2088_v13 = vsub.f32 0.0, %v3005_v60 }
 0x27e   : > { %v3007_v19 = vpop.eup %3006  ;;  %v2299_v54 = vadd.f32 %v2298_v42, %v2213_v10  ;;  %v1967_v35 = vmul.f32 0.5, %v2608_v50  ;;  %v2151_v58 = vsub.f32 %v885_v38, %v2087_v40  ;;  %v1841_v43 = vsub.f32 %v4124_v20, %v1727_v37 }
 0x27f   : > { %3016 = vtanh.f32 %v1966_v44  ;;  %v2214_v32 = vmul.f32 %v2150_v4, %v2150_v4  ;;  %v2609_v21 = vadd.f32 -1.1, %v1840_v7  ;;  %v1731_v51 = vpop.f32.mrb[40].mxu1  ;;  %v2089_v57 = vsub.f32 0.0, %v3007_v19 }
 0x280   : > { %3018 = vtanh.f32 %v1967_v35  ;;  %v2215_v41 = vmul.f32 %v2151_v58, %v2151_v58  ;;  %v2610_v3 = vadd.f32 -1.1, %v1841_v43  ;;  %v889_v11 = vpop.f32.mrb[30].mxu0  ;;  %v1842_v22 = vsub.f32 %v4121_v9, %v1731_v51  ;;  %v1733_v29 = vpop.f32.mrb[41].mxu1 }
 0x281   : > { %v3009_v0 = vpop.eup %3008  ;;  %v2263_v34 = vadd.f32 %v2262_v26, %v2214_v32  ;;  %v1968_v28 = vmul.f32 0.5, %v2609_v21  ;;  %v2152_v5 = vsub.f32 %v889_v11, %v2088_v13  ;;  %v891_v23 = vpop.f32.mrb[31].mxu0  ;;  %v1843_v15 = vsub.f32 %v4124_v20, %v1733_v29 }
 0x282   : > { %v3011_v49 = vpop.eup %3010  ;;  %v2300_v30 = vadd.f32 %v2299_v54, %v2215_v41  ;;  %v1969_v45 = vmul.f32 0.5, %v2610_v3  ;;  %v2153_v63 = vsub.f32 %v891_v23, %v2089_v57  ;;  %v2611_v6 = vadd.f32 -1.1, %v1842_v22 }
 0x283   : > { %3020 = vtanh.f32 %v1968_v28  ;;  %v2216_v56 = vmul.f32 %v2152_v5, %v2152_v5  ;;  %v2090_v52 = vsub.f32 0.0, %v3009_v0  ;;  %v2612_v31 = vadd.f32 -1.1, %v1843_v15  ;;  %v1737_v36 = vpop.f32.mrb[42].mxu1 }
 0x284   : > { %3022 = vtanh.f32 %v1969_v45  ;;  %v2217_v14 = vmul.f32 %v2153_v63, %v2153_v63  ;;  %v895_v12 = vpop.f32.mrb[32].mxu0  ;;  %v2091_v39 = vsub.f32 0.0, %v3011_v49  ;;  %v3013_v59 = vpop.eup %3012  ;;  %v1970_v27 = vmul.f32 0.5, %v2611_v6 }
 0x285   : > { %v2264_v55 = vadd.f32 %v2263_v34, %v2216_v56  ;;  %v2154_v8 = vsub.f32 %v895_v12, %v2090_v52  ;;  %v1844_v47 = vsub.f32 %v4121_v9, %v1737_v36  ;;  %v897_v17 = vpop.f32.mrb[33].mxu0  ;;  %v1739_v46 = vpop.f32.mrb[43].mxu1  ;;  %v1971_v53 = vmul.f32 0.5, %v2612_v31 }
 0x286   : > { %v3015_v62 = vpop.eup %3014  ;;  %v2301_v2 = vadd.f32 %v2300_v30, %v2217_v14  ;;  %v2155_v42 = vsub.f32 %v897_v17, %v2091_v39  ;;  %v1845_v33 = vsub.f32 %v4124_v20, %v1739_v46  ;;  %3024 = vtanh.f32 %v1970_v27 }
 0x287   : > { %v2218_v1 = vmul.f32 %v2154_v8, %v2154_v8  ;;  %v2613_v16 = vadd.f32 -1.1, %v1844_v47  ;;  %v2092_v18 = vsub.f32 0.0, %v3013_v59  ;;  %3026 = vtanh.f32 %v1971_v53  ;;  %v1743_v50 = vpop.f32.mrb[44].mxu1 }
 0x288   : > { %v2219_v25 = vmul.f32 %v2155_v42, %v2155_v42  ;;  %v2614_v48 = vadd.f32 -1.1, %v1845_v33  ;;  %v901_v10 = vpop.f32.mrb[34].mxu0  ;;  %v2093_v24 = vsub.f32 0.0, %v3015_v62  ;;  %v1846_v44 = vsub.f32 %v4121_v9, %v1743_v50  ;;  %v1745_v7 = vpop.f32.mrb[45].mxu1 }
 0x289   : > { %v3017_v61 = vpop.eup %3016  ;;  %v2265_v40 = vadd.f32 %v2264_v55, %v2218_v1  ;;  %v1972_v60 = vmul.f32 0.5, %v2613_v16  ;;  %v2156_v26 = vsub.f32 %v901_v10, %v2092_v18  ;;  %v903_v4 = vpop.f32.mrb[35].mxu0  ;;  %v1847_v35 = vsub.f32 %v4124_v20, %v1745_v7 }
 0x28a   : > { %v3019_v38 = vpop.eup %3018  ;;  %v2302_v37 = vadd.f32 %v2301_v2, %v2219_v25  ;;  %v1973_v19 = vmul.f32 0.5, %v2614_v48  ;;  %v2157_v54 = vsub.f32 %v903_v4, %v2093_v24  ;;  %v2615_v43 = vadd.f32 -1.1, %v1846_v44 }
 0x28b   : > { %3028 = vtanh.f32 %v1972_v60  ;;  %v2220_v58 = vmul.f32 %v2156_v26, %v2156_v26  ;;  %v2094_v32 = vsub.f32 0.0, %v3017_v61  ;;  %v2616_v13 = vadd.f32 -1.1, %v1847_v35  ;;  %v1749_v3 = vpop.f32.mrb[46].mxu1 }
 0x28c   : > { %3030 = vtanh.f32 %v1973_v19  ;;  %v2221_v21 = vmul.f32 %v2157_v54, %v2157_v54  ;;  %v907_v41 = vpop.f32.mrb[36].mxu0  ;;  %v2095_v11 = vsub.f32 0.0, %v3019_v38  ;;  %v1974_v0 = vmul.f32 0.5, %v2615_v43  ;;  %v1751_v22 = vpop.f32.mrb[47].mxu1 }
 0x28d   : > { %v3021_v51 = vpop.eup %3020  ;;  %v2266_v57 = vadd.f32 %v2265_v40, %v2220_v58  ;;  %v2158_v34 = vsub.f32 %v907_v41, %v2094_v32  ;;  %v1848_v28 = vsub.f32 %v4121_v9, %v1749_v3  ;;  %v909_v5 = vpop.f32.mrb[37].mxu0  ;;  %v1975_v49 = vmul.f32 0.5, %v2616_v13 }
 0x28e   : > { %v3023_v23 = vpop.eup %3022  ;;  %v2303_v29 = vadd.f32 %v2302_v37, %v2221_v21  ;;  %v2159_v30 = vsub.f32 %v909_v5, %v2095_v11  ;;  %v1849_v45 = vsub.f32 %v4124_v20, %v1751_v22  ;;  %3032 = vtanh.f32 %v1974_v0 }
 0x28f   : > { %v2222_v63 = vmul.f32 %v2158_v34, %v2158_v34  ;;  %v2617_v15 = vadd.f32 -1.1, %v1848_v28  ;;  %v2096_v56 = vsub.f32 0.0, %v3021_v51  ;;  %3034 = vtanh.f32 %v1975_v49  ;;  %v1755_v31 = vpop.f32.mrb[48].mxu1 }
 0x290   : > { %v2223_v6 = vmul.f32 %v2159_v30, %v2159_v30  ;;  %v2618_v52 = vadd.f32 -1.1, %v1849_v45  ;;  %v913_v14 = vpop.f32.mrb[38].mxu0  ;;  %v2097_v12 = vsub.f32 0.0, %v3023_v23  ;;  %v3025_v36 = vpop.eup %3024  ;;  %v1850_v27 = vsub.f32 %v4121_v9, %v1755_v31 }
 0x291   : > { %v2267_v39 = vadd.f32 %v2266_v57, %v2222_v63  ;;  %v1976_v59 = vmul.f32 0.5, %v2617_v15  ;;  %v2160_v55 = vsub.f32 %v913_v14, %v2096_v56  ;;  %v915_v8 = vpop.f32.mrb[39].mxu0  ;;  %v1757_v47 = vpop.f32.mrb[49].mxu1  ;;  %v2098_v1 = vsub.f32 0.0, %v3025_v36 }
 0x292   : > { %v3027_v17 = vpop.eup %3026  ;;  %v2304_v46 = vadd.f32 %v2303_v29, %v2223_v6  ;;  %v1977_v62 = vmul.f32 0.5, %v2618_v52  ;;  %v2161_v2 = vsub.f32 %v915_v8, %v2097_v12  ;;  %v1851_v53 = vsub.f32 %v4124_v20, %v1757_v47 }
 0x293   : > { %3036 = vtanh.f32 %v1976_v59  ;;  %v2224_v42 = vmul.f32 %v2160_v55, %v2160_v55  ;;  %v2619_v33 = vadd.f32 -1.1, %v1850_v27  ;;  %v1761_v48 = vpop.f32.mrb[50].mxu1  ;;  %v2099_v10 = vsub.f32 0.0, %v3027_v17 }
 0x294   : > { %3038 = vtanh.f32 %v1977_v62  ;;  %v2225_v16 = vmul.f32 %v2161_v2, %v2161_v2  ;;  %v2620_v18 = vadd.f32 -1.1, %v1851_v53  ;;  %v919_v25 = vpop.f32.mrb[40].mxu0  ;;  %v1852_v60 = vsub.f32 %v4121_v9, %v1761_v48  ;;  %v1763_v44 = vpop.f32.mrb[51].mxu1 }
 0x295   : > { %v3029_v50 = vpop.eup %3028  ;;  %v2268_v24 = vadd.f32 %v2267_v39, %v2224_v42  ;;  %v1978_v61 = vmul.f32 0.5, %v2619_v33  ;;  %v2162_v40 = vsub.f32 %v919_v25, %v2098_v1  ;;  %v921_v26 = vpop.f32.mrb[41].mxu0  ;;  %v1853_v19 = vsub.f32 %v4124_v20, %v1763_v44 }
 0x296   : > { %v3031_v4 = vpop.eup %3030  ;;  %v2305_v7 = vadd.f32 %v2304_v46, %v2225_v16  ;;  %v1979_v38 = vmul.f32 0.5, %v2620_v18  ;;  %v2163_v37 = vsub.f32 %v921_v26, %v2099_v10  ;;  %v2621_v35 = vadd.f32 -1.1, %v1852_v60 }
 0x297   : > { %3040 = vtanh.f32 %v1978_v61  ;;  %v2226_v54 = vmul.f32 %v2162_v40, %v2162_v40  ;;  %v2100_v58 = vsub.f32 0.0, %v3029_v50  ;;  %v2622_v32 = vadd.f32 -1.1, %v1853_v19  ;;  %v1767_v13 = vpop.f32.mrb[52].mxu1 }
 0x298   : > { %3042 = vtanh.f32 %v1979_v38  ;;  %v2227_v43 = vmul.f32 %v2163_v37, %v2163_v37  ;;  %v925_v21 = vpop.f32.mrb[42].mxu0  ;;  %v2101_v41 = vsub.f32 0.0, %v3031_v4  ;;  %v3033_v3 = vpop.eup %3032  ;;  %v1980_v51 = vmul.f32 0.5, %v2621_v35 }
 0x299   : > { %v2269_v11 = vadd.f32 %v2268_v24, %v2226_v54  ;;  %v2164_v57 = vsub.f32 %v925_v21, %v2100_v58  ;;  %v1854_v0 = vsub.f32 %v4121_v9, %v1767_v13  ;;  %v927_v34 = vpop.f32.mrb[43].mxu0  ;;  %v1769_v28 = vpop.f32.mrb[53].mxu1  ;;  %v1981_v23 = vmul.f32 0.5, %v2622_v32 }
 0x29a   : > { %v3035_v5 = vpop.eup %3034  ;;  %v2306_v22 = vadd.f32 %v2305_v7, %v2227_v43  ;;  %v2165_v29 = vsub.f32 %v927_v34, %v2101_v41  ;;  %v1855_v49 = vsub.f32 %v4124_v20, %v1769_v28  ;;  %3044 = vtanh.f32 %v1980_v51 }
 0x29b   : > { %v2228_v30 = vmul.f32 %v2164_v57, %v2164_v57  ;;  %v2623_v45 = vadd.f32 -1.1, %v1854_v0  ;;  %v2102_v63 = vsub.f32 0.0, %v3033_v3  ;;  %3046 = vtanh.f32 %v1981_v23  ;;  %v1773_v52 = vpop.f32.mrb[54].mxu1 }
 0x29c   : > { %v2229_v15 = vmul.f32 %v2165_v29, %v2165_v29  ;;  %v2624_v56 = vadd.f32 -1.1, %v1855_v49  ;;  %v931_v6 = vpop.f32.mrb[44].mxu0  ;;  %v2103_v14 = vsub.f32 0.0, %v3035_v5  ;;  %v1856_v59 = vsub.f32 %v4121_v9, %v1773_v52  ;;  %v1775_v27 = vpop.f32.mrb[55].mxu1 }
 0x29d   : > { %v3037_v31 = vpop.eup %3036  ;;  %v2270_v12 = vadd.f32 %v2269_v11, %v2228_v30  ;;  %v1982_v36 = vmul.f32 0.5, %v2623_v45  ;;  %v2166_v39 = vsub.f32 %v931_v6, %v2102_v63  ;;  %v933_v55 = vpop.f32.mrb[45].mxu0  ;;  %v1857_v62 = vsub.f32 %v4124_v20, %v1775_v27 }
 0x29e   : > { %v3039_v8 = vpop.eup %3038  ;;  %v2307_v47 = vadd.f32 %v2306_v22, %v2229_v15  ;;  %v1983_v17 = vmul.f32 0.5, %v2624_v56  ;;  %v2167_v46 = vsub.f32 %v933_v55, %v2103_v14  ;;  %v2625_v53 = vadd.f32 -1.1, %v1856_v59 }
 0x29f   : > { %3048 = vtanh.f32 %v1982_v36  ;;  %v2230_v2 = vmul.f32 %v2166_v39, %v2166_v39  ;;  %v2104_v42 = vsub.f32 0.0, %v3037_v31  ;;  %v2626_v1 = vadd.f32 -1.1, %v1857_v62  ;;  %v4189_v18 = vpop.f32.mrb[56].mxu1 }
 0x2a0   : > { %3050 = vtanh.f32 %v1983_v17  ;;  %v2231_v33 = vmul.f32 %v2167_v46, %v2167_v46  ;;  %v937_v16 = vpop.f32.mrb[46].mxu0  ;;  %v2105_v25 = vsub.f32 0.0, %v3039_v8  ;;  %v1984_v50 = vmul.f32 0.5, %v2625_v53  ;;  %v1781_v60 = vpop.f32.mrb[57].mxu1 }
 0x2a1   : > { %v3041_v48 = vpop.eup %3040  ;;  %v2271_v10 = vadd.f32 %v2270_v12, %v2230_v2  ;;  %v2168_v24 = vsub.f32 %v937_v16, %v2104_v42  ;;  %v1858_v61 = vsub.f32 %v4121_v9, %v4189_v18  ;;  %v939_v40 = vpop.f32.mrb[47].mxu0  ;;  %v1985_v4 = vmul.f32 0.5, %v2626_v1 }
 0x2a2   : > { %v3043_v26 = vpop.eup %3042  ;;  %v2308_v44 = vadd.f32 %v2307_v47, %v2231_v33  ;;  %v2169_v7 = vsub.f32 %v939_v40, %v2105_v25  ;;  %v1859_v38 = vsub.f32 %v4124_v20, %v1781_v60  ;;  %3052 = vtanh.f32 %v1984_v50 }
 0x2a3   : > { %v2232_v37 = vmul.f32 %v2168_v24, %v2168_v24  ;;  %v2106_v19 = vsub.f32 0.0, %v3041_v48  ;;  %3054 = vtanh.f32 %v1985_v4  ;;  %v2107_v58 = vsub.f32 0.0, %v3043_v26 }
 0x2a4   : > { %v2233_v54 = vmul.f32 %v2169_v7, %v2169_v7  ;;  %v943_v35 = vpop.f32.mrb[48].mxu0  ;;  %v3045_v43 = vpop.eup %3044  ;;  %v2627_v48 = vadd.f32 -1.1, %v1858_v61 }
 0x2a5   : > { %v2272_v32 = vadd.f32 %v2271_v10, %v2232_v37  ;;  %v2170_v21 = vsub.f32 %v943_v35, %v2106_v19  ;;  %v945_v13 = vpop.f32.mrb[49].mxu0  ;;  %v3047_v41 = vpop.eup %3046  ;;  %v2108_v51 = vsub.f32 0.0, %v3045_v43  ;;  %v2628_v10 = vadd.f32 -1.1, %v1859_v38 }
 0x2a6   : > { %v2309_v3 = vadd.f32 %v2308_v44, %v2233_v54  ;;  %v2171_v11 = vsub.f32 %v945_v13, %v2107_v58  ;;  %v2109_v0 = vsub.f32 0.0, %v3047_v41  ;;  %v1986_v26 = vmul.f32 0.5, %v2627_v48 }
 0x2a7   : > { %v2234_v57 = vmul.f32 %v2170_v21, %v2170_v21  ;;  %v1987_v4 = vmul.f32 0.5, %v2628_v10 }
 0x2a8   : > { %v2235_v34 = vmul.f32 %v2171_v11, %v2171_v11  ;;  %v949_v28 = vpop.f32.mrb[50].mxu0  ;;  %3056 = vtanh.f32 %v1986_v26 }
 0x2a9   : > { %v3049_v5 = vpop.eup %3048  ;;  %v2273_v22 = vadd.f32 %v2272_v32, %v2234_v57  ;;  %v2172_v23 = vsub.f32 %v949_v28, %v2108_v51  ;;  %v951_v29 = vpop.f32.mrb[51].mxu0  ;;  %3058 = vtanh.f32 %v1987_v4 }
 0x2aa   : > { %v3051_v49 = vpop.eup %3050  ;;  %v2310_v30 = vadd.f32 %v2309_v3, %v2235_v34  ;;  %v2173_v45 = vsub.f32 %v951_v29, %v2109_v0  ;;  %v2110_v63 = vsub.f32 0.0, %v3049_v5 }
 0x2ab   : > { %v2236_v15 = vmul.f32 %v2172_v23, %v2172_v23  ;;  %v2111_v56 = vsub.f32 0.0, %v3051_v49 }
 0x2ac   : > { %v2237_v6 = vmul.f32 %v2173_v45, %v2173_v45  ;;  %v955_v52 = vpop.f32.mrb[52].mxu0  ;;  %v3053_v14 = vpop.eup %3052 }
 0x2ad   : > { %v2274_v31 = vadd.f32 %v2273_v22, %v2236_v15  ;;  %v2174_v12 = vsub.f32 %v955_v52, %v2110_v63  ;;  %v957_v36 = vpop.f32.mrb[53].mxu0  ;;  %v3055_v39 = vpop.eup %3054  ;;  %v2112_v27 = vsub.f32 0.0, %v3053_v14 }
 0x2ae   : > { %v2311_v59 = vadd.f32 %v2310_v30, %v2237_v6  ;;  %v2175_v55 = vsub.f32 %v957_v36, %v2111_v56  ;;  %v2113_v47 = vsub.f32 0.0, %v3055_v39 }
 0x2af   : > { %v2238_v8 = vmul.f32 %v2174_v12, %v2174_v12 }
 0x2b0   : > { %v2239_v17 = vmul.f32 %v2175_v55, %v2175_v55  ;;  %v961_v46 = vpop.f32.mrb[54].mxu0 }
 0x2b1   : > { %v2275_v62 = vadd.f32 %v2274_v31, %v2238_v8  ;;  %v2176_v2 = vsub.f32 %v961_v46, %v2112_v27  ;;  %v963_v53 = vpop.f32.mrb[55].mxu0 }
 0x2b2   : > { %v2312_v42 = vadd.f32 %v2311_v59, %v2239_v17  ;;  %v2177_v33 = vsub.f32 %v963_v53, %v2113_v47  ;;  %v3057_v41 = vpop.eup %3056 }
 0x2b3   : > { %v2240_v1 = vmul.f32 %v2176_v2, %v2176_v2  ;;  %v3059_v51 = vpop.eup %3058  ;;  %v2114_v28 = vsub.f32 0.0, %v3057_v41 }
 0x2b4   : > { %v2241_v16 = vmul.f32 %v2177_v33, %v2177_v33  ;;  %v2115_v29 = vsub.f32 0.0, %v3059_v51 }
 0x2b5   : > { %v2276_v18 = vadd.f32 %v2275_v62, %v2240_v1 }
 0x2b6   : > { %v2313_v25 = vadd.f32 %v2312_v42, %v2241_v16 }
 0x2e0   : > { %v1785_v50 = vpop.f32.mrb[58].mxu1 }
 0x2e1   : > { %v1860_v24 = vsub.f32 %v4121_v9, %v1785_v50  ;;  %v1787_v40 = vpop.f32.mrb[59].mxu1 }
 0x2e2   : > { %v1861_v60 = vsub.f32 %v4124_v20, %v1787_v40 }
 0x2e3   : > { %v2629_v44 = vadd.f32 -1.1, %v1860_v24 }
 0x2e4   : > { %v2630_v7 = vadd.f32 -1.1, %v1861_v60  ;;  %v1791_v37 = vpop.f32.mrb[60].mxu1 }
 0x2e5   : > { %v1862_v19 = vsub.f32 %v4121_v9, %v1791_v37  ;;  %v1793_v54 = vpop.f32.mrb[61].mxu1  ;;  %v1988_v58 = vmul.f32 0.5, %v2629_v44 }
 0x2e6   : > { %v1863_v35 = vsub.f32 %v4124_v20, %v1793_v54  ;;  %v1989_v38 = vmul.f32 0.5, %v2630_v7 }
 0x2e7   : > { %v2631_v61 = vadd.f32 -1.1, %v1862_v19  ;;  %3060 = vtanh.f32 %v1988_v58 }
 0x2e8   : > { %v2632_v43 = vadd.f32 -1.1, %v1863_v35  ;;  %3062 = vtanh.f32 %v1989_v38  ;;  %v3169_v38 = vmov 1966171168  }
 0x2e9   : > { %v1990_v32 = vmul.f32 0.5, %v2631_v61 }
 0x2ea   : > { %v1991_v21 = vmul.f32 0.5, %v2632_v43  ;;  %v2328_v43 = vunpack.c.l.s4 %v3169_v38 }
 0x2eb   : > { %3064 = vtanh.f32 %v1990_v32  ;;  %v2330_v32 = vlaneseq }
 0x2ec   : > { %3066 = vtanh.f32 %v1991_v21 }
 0x2ed   : > { %v2331_v51 = vshrl.u32 %v2330_v32, 7  ;;  %vm2344_vm2 = vcmp.lt.s32.totalorder %v2330_v32, 256 }
 0x2f1   : > { %v1797_v13 = vpop.f32.mrb[62].mxu1  ;;  %v3061_v5 = vpop.eup %3060 }
 0x2f2   : > { %v1864_v3 = vsub.f32 %v4121_v9, %v1797_v13  ;;  %v1799_v11 = vpop.f32.mrb[63].mxu1  ;;  %v3063_v49 = vpop.eup %3062  ;;  %v2116_v9 = vsub.f32 0.0, %v3061_v5 }
 0x2f3   : > { %v1865_v57 = vsub.f32 %v4124_v20, %v1799_v11  ;;  %v2117_v20 = vsub.f32 0.0, %v3063_v49  ;;  %v2329_v11 = vunpack.c.0.s8 %v2328_v43 }
 0x2f4   : > { %v2633_v0 = vadd.f32 -1.1, %v1864_v3 }
 0x2f5   : > { %v2634_v34 = vadd.f32 -1.1, %v1865_v57  ;;  %v967_v23 = vpop.f32.mrb[56].mxu0  ;;  %v3065_v6 = vpop.eup %3064  ;;  %v2332_v5 = vsub.s32 %v2329_v11, %v2331_v51 }
 0x2f6   : > { %v1992_v22 = vmul.f32 0.5, %v2633_v0  ;;  %v2178_v45 = vsub.f32 %v967_v23, %v2114_v28  ;;  %v969_v63 = vpop.f32.mrb[57].mxu0  ;;  %v3067_v31 = vpop.eup %3066  ;;  %v2118_v8 = vsub.f32 0.0, %v3065_v6 }
 0x2f7   : > { %v1993_v30 = vmul.f32 0.5, %v2634_v34  ;;  %v2179_v15 = vsub.f32 %v969_v63, %v2115_v29  ;;  %v2119_v46 = vsub.f32 0.0, %v3067_v31 }
 0x2f8   : > { %3068 = vtanh.f32 %v1992_v22  ;;  %v2242_v56 = vmul.f32 %v2178_v45, %v2178_v45 }
 0x2f9   : > { %3070 = vtanh.f32 %v1993_v30  ;;  %v2243_v52 = vmul.f32 %v2179_v15, %v2179_v15  ;;  %v973_v14 = vpop.f32.mrb[58].mxu0 }
 0x2fa   : > { %v2277_v12 = vadd.f32 %v2276_v18, %v2242_v56  ;;  %v2180_v36 = vsub.f32 %v973_v14, %v2116_v9  ;;  %v975_v39 = vpop.f32.mrb[59].mxu0 }
 0x2fb   : > { %v2314_v59 = vadd.f32 %v2313_v25, %v2243_v52  ;;  %v2181_v55 = vsub.f32 %v975_v39, %v2117_v20 }
 0x2fc   : > { %v2244_v27 = vmul.f32 %v2180_v36, %v2180_v36 }
 0x2fd   : > { %v2245_v47 = vmul.f32 %v2181_v55, %v2181_v55  ;;  %v979_v17 = vpop.f32.mrb[60].mxu0 }
 0x2fe   : > { %v2278_v62 = vadd.f32 %v2277_v12, %v2244_v27  ;;  %v2182_v2 = vsub.f32 %v979_v17, %v2118_v8  ;;  %v981_v53 = vpop.f32.mrb[61].mxu0 }
 0x2ff   : > { %v2315_v42 = vadd.f32 %v2314_v59, %v2245_v47  ;;  %v2183_v33 = vsub.f32 %v981_v53, %v2119_v46 }
 0x300   : > { %v2246_v1 = vmul.f32 %v2182_v2, %v2182_v2 }
 0x301   : > { %v2247_v48 = vmul.f32 %v2183_v33, %v2183_v33  ;;  %v985_v10 = vpop.f32.mrb[62].mxu0 }
 0x302   : > { %v3069_v16 = vpop.eup %3068  ;;  %v2279_v18 = vadd.f32 %v2278_v62, %v2246_v1  ;;  %v987_v40 = vpop.f32.mrb[63].mxu0 }
 0x303   : > { %v3071_v50 = vpop.eup %3070  ;;  %v2120_v24 = vsub.f32 0.0, %v3069_v16  ;;  %v2316_v25 = vadd.f32 %v2315_v42, %v2247_v48 }
 0x304   : > { %v2121_v60 = vsub.f32 0.0, %v3071_v50 }
 0x305   : > { %v2184_v26 = vsub.f32 %v985_v10, %v2120_v24 }
 0x306   : > { %v2185_v44 = vsub.f32 %v987_v40, %v2121_v60 }
 0x307   : > { %v2248_v4 = vmul.f32 %v2184_v26, %v2184_v26 }
 0x308   : > { %v2249_v7 = vmul.f32 %v2185_v44, %v2185_v44 }
 0x309   : > { %v2280_v37 = vadd.f32 %v2279_v18, %v2248_v4 }
 0x30a   : > { %v2317_v19 = vadd.f32 %v2316_v25, %v2249_v7 }
 0x30b   : > { %v2281_v54 = vrot.slane %v2280_v37, 4 }
 0x30c   : > { %v2318_v35 = vrot.slane %v2317_v19, 4 }
 0x30d   : > { %v2282_v58 = vadd.f32 %v2281_v54, %v2280_v37 }
 0x30e   : > { %v2319_v61 = vadd.f32 %v2318_v35, %v2317_v19 }
 0x30f   : > { %v2283_v21 = vrot.slane %v2282_v58, 2 }
 0x310   : > { %v2320_v13 = vrot.slane %v2319_v61, 2 }
 0x311   : > { %v2284_v41 = vadd.f32 %v2283_v21, %v2282_v58 }
 0x312   : > { %v2321_v3 = vadd.f32 %v2320_v13, %v2319_v61 }
 0x313   : > { %v2285_v57 = vrot.slane %v2284_v41, 1 }
 0x314   : > { %v2322_v0 = vrot.slane %v2321_v3, 1 }
 0x315   : > { %v2286_v34 = vadd.f32 %v2285_v57, %v2284_v41 }
 0x316   : > { %v2323_v28 = vadd.f32 %v2322_v0, %v2321_v3 }
 0x318   : > { %v2326_v22 = vcombine.low %v2286_v34, %v2323_v28 }
 0x31a   : > { %v2333_v23 = vrot.slane %v2326_v22, %v2332_v5 }
 0x31c   : > { %v2340_v29 = vrot.slane %v2333_v23, %v2332_v5 }
 0x31e   : > { %2346 = vst.msk [vmem:[%s269_s13] sm:$0x3] %vm2344_vm2, %v2340_v29 }
 0x31f   : > { %3085 = shalt.err (!%p3082_p7)
}
 0x320   : > { %s3086_s8 = scalar_lea.hbm %s4206_s5, 32  ;;  %s3090_s10 = scalar_lea.hbm %s4263_s4, 192 }
 0x321   : > { %p3087_p9 = scmp.ne.s32.totalorder %s4206_s5, %s3086_s8  ;;  %p3091_p12 = scmp.lt.u32.totalorder %s4206_s5, %s4263_s4 }
 0x322   : > { %p3092_p13 = scmp.lt.u32.totalorder %s3090_s10, %s3086_s8  ;;  %p3094_p1 = scmp.lt.u32.totalorder %s3086_s8, %s4206_s5 }
 0x323   : > { %p3088_p10 = pnand %p3087_p9, %p3247_p3 }
 0x324   : > { %p3093_p0 = por %p3092_p13, %p3091_p12 }
 0x325   : > { %p3089_p11 = pneg %p3088_p10 }
 0x326   : > { %p3095_p2 = por %p3094_p1, %p3093_p0 }
 0x328   : > { %p3096_p4 = pnand %p3095_p2, %p3089_p11 }
 0x32a   : > { %3099 = shalt.err (!%p3096_p4)
}
 0x32b   : > { %2655 = dma.vmem_to_hbm [thread:$0]  (%p3247_p3), %s4208_s14, 32, %s4206_s5, %s2348_s18  }
 0x32c PF: > { %p2661_p5 = scmp.ge.s32.totalorder %s3166_s22, 2  ;;  %s2376_s27 = sand.u32 1, %s3138_s15  }
 0x32d   : > { %s2377_s30 = scalar_lea.sflag [#allocation3], %s2376_s27 }
 0x32e   : > { %p2658_p6 = pnand %p2661_p5, %p3256_p8 }
 0x330   : > { %3133 = dma.done.wait (!%p2658_p6), %s2377_s30, 32  }
 0x331   : > { %3135 = vsyncadd (!%p2658_p6), %s2377_s30, 4294967264  ;;  %s17_s22 = sadd.s32 1, %s3166_s22   ;;  %s4311_s15 = smov %s3142_s16 }
 0x332   : > { %p14_p7 = scmp.ge.s32.totalorder %s17_s22, 8   ;;  %s4312_s16 = smov %s3146_s17 }
 0x333   : > { %s4313_s17 = smov %s3265_s7  ;;  %s4314_s18 = smov %s3158_s20 }
 0x334   : > { %s4315_s19 = smov %s3162_s21  ;;  %s4316_s20 = smov %s4319_s25 }
 0x335   : > { %s4317_s21 = smov %s4323_s26  ;;  %16 = sbr.rel (!%p14_p7) target bundleno = 5 (0x5), region = 80 }
 0x33c   :  { %2382 = vsyncpa [#allocation3], 1 }
 0x33d   :  { %2384 = vsyncpa [#allocation3 + $0x1], 1 }

</bundles_post_ra>
